<compile_context>
chip_gen: v5e
topology: v5e:2x2
jax: 0.10.0
libtpu: 0.0.40
codegen_flags: <defaults>
</compile_context>

<pallas_src>
import numpy as np
import jax
import jax.numpy as jnp
from jax.experimental import pallas as pl
from jax.experimental.pallas import tpu as pltpu


def _nearest_src_indices(out_size, in_size, scale_factor):
    """PyTorch F.interpolate(mode='nearest', recompute_scale_factor=False) source indices."""
    if scale_factor is not None:
        scale = 1.0 / float(scale_factor)
    else:
        scale = float(in_size) / float(out_size)
    idx = np.floor(np.arange(out_size, dtype=np.float64) * scale).astype(np.int64)
    return np.minimum(idx, in_size - 1)


def _contiguous_runs(src_idx):
    """Group output rows by source row into contiguous runs: [(src_row, start_out_row, count)]."""
    runs = []
    for h, s in enumerate(src_idx.tolist()):
        s = int(s)
        if runs and runs[-1][0] == s and runs[-1][1] + runs[-1][2] == h:
            runs[-1] = (s, runs[-1][1], runs[-1][2] + 1)
        else:
            runs.append((s, h, 1))
    return runs


def _round_up(v, m):
    return ((v + m - 1) // m) * m


def _choose_plane_tile(p, h_in, w_in, h_out, w_out, itemsize):
    """Planes per grid step: ~2 MiB of live block data per step (pipeline-friendly), VMEM-capped."""
    in_bytes = _round_up(h_in, 8) * _round_up(w_in, 128) * itemsize   # input tile is (8,128)-padded
    out_bytes = _round_up(h_out * w_out, 128) * itemsize              # lane-dense output tile
    per_plane = in_bytes + out_bytes
    target = 2 * 1024 * 1024      # per-step block bytes: amortizes ~0.35us/step, keeps steps small
    vmem_cap = 8 * 1024 * 1024    # double-buffered footprint cap (fits v5e's 16 MiB scoped default)
    tp = min(target // per_plane, vmem_cap // (2 * per_plane))
    tp = max(1, tp)
    if tp >= p:
        return p
    # Partial tiling: keep the 2D output block's second-minor dim a multiple of 8.
    # TODO(synk): planes too large even for TP=8 would additionally need spatial tiling.
    return max(8, (tp // 8) * 8)


def interpolate2d(x, size=None, scale_factor=None, mode="nearest", align_corners=False):
    """Pallas equivalent of Interpolate2d.forward for 4D NCHW input, mode='nearest'."""
    if mode != "nearest":
        # TODO(synk): linear/bilinear/bicubic/trilinear not implemented; EfficientDet uses 'nearest'.
        raise NotImplementedError("only mode='nearest' is implemented")
    if x.ndim != 4:
        # TODO(synk): 3D / 5D inputs not implemented.
        raise NotImplementedError("only 4D NCHW input is implemented")

    n, c, h_in, w_in = x.shape

    # Resolve output size / per-axis scale factors (PyTorch semantics, recompute_scale_factor=False).
    if size is not None:
        if isinstance(size, int):
            h_out, w_out = size, size
        else:
            h_out, w_out = int(size[0]), int(size[1])
        sf_h = sf_w = None
    else:
        if isinstance(scale_factor, (tuple, list)):
            sf_h, sf_w = float(scale_factor[0]), float(scale_factor[1])
        else:
            sf_h = sf_w = float(scale_factor)
        h_out = int(h_in * sf_h)
        w_out = int(w_in * sf_w)

    p = n * c
    out_dtype = x.dtype
    # TODO(synk): integer dtypes go through f32 (exact only for |x| < 2**24).
    compute_dtype = (jnp.dtype(x.dtype) if jnp.issubdtype(x.dtype, jnp.floating)
                     else jnp.dtype(jnp.float32))

    # Host-side (float64) nearest-neighbor source indices and H-axis run grouping.
    h_src = _nearest_src_indices(h_out, h_in, sf_h)
    w_src = _nearest_src_indices(w_out, w_in, sf_w)
    h_runs = _contiguous_runs(h_src)
    w_identity = (w_out == w_in) and bool(np.array_equal(w_src, np.arange(w_in)))

    # One-hot lane-selection matrix for the W axis (0/1 weights are exact in any float dtype).
    pw_np = np.zeros((w_in, w_out), dtype=np.float32)
    pw_np[w_src, np.arange(w_out)] = 1.0
    pw = jnp.asarray(pw_np, dtype=compute_dtype)

    itemsize = jnp.dtype(x.dtype).itemsize
    tp = _choose_plane_tile(p, h_in, w_in, h_out, w_out, itemsize)
    grid = (pl.cdiv(p, tp),)

    # float32 inputs must not be truncated to bf16 by the MXU -> force exact precision.
    precision = (jax.lax.Precision.HIGHEST
                 if compute_dtype == jnp.dtype(jnp.float32) else None)

    def kernel(x_ref, pw_ref, o_ref):
        # x_ref: (TP, H_in, W_in), pw_ref: (W_in, W_out), o_ref: (TP, H_out*W_out) lane-dense.
        pw_v = None if w_identity else pw_ref[...]
        for src, start, count in h_runs:
            row = x_ref[:, src, :]                                      # (TP, W_in) sublane load
            if w_identity:
                seg = row.astype(o_ref.dtype)                           # pure H resize: no MXU
            else:
                seg = jnp.dot(row.astype(compute_dtype), pw_v,
                              precision=precision,
                              preferred_element_type=jnp.float32)       # (TP, W_out) lane gather
                seg = seg.astype(o_ref.dtype)
            if count > 1:                                               # replicate rows sharing src
                seg = jnp.tile(seg, (1, count))                         # (TP, count*W_out)
            o_ref[:, start * w_out:(start + count) * w_out] = seg

    cost = pl.CostEstimate(
        flops=0 if w_identity else 2 * p * len(h_runs) * w_in * w_out,
        transcendentals=0,
        bytes_accessed=(p * h_in * w_in + p * h_out * w_out) * itemsize
        + w_in * w_out * compute_dtype.itemsize,
    )

    out_flat = pl.pallas_call(
        kernel,
        out_shape=jax.ShapeDtypeStruct((p, h_out * w_out), out_dtype),
        grid_spec=pltpu.PrefetchScalarGridSpec(
            num_scalar_prefetch=0,
            grid=grid,
            in_specs=[
                pl.BlockSpec((tp, h_in, w_in), lambda i: (i, 0, 0)),
                pl.BlockSpec((w_in, w_out), lambda i: (0, 0)),
            ],
            out_specs=pl.BlockSpec((tp, h_out * w_out), lambda i: (i, 0)),
        ),
        compiler_params=pltpu.CompilerParams(dimension_semantics=("parallel",)),
        cost_estimate=cost,
    )(x.reshape(p, h_in, w_in), pw)

    return out_flat.reshape(n, c, h_out, w_out)


if __name__ == "__main__":
    key = jax.random.PRNGKey(0)
    x = jax.random.normal(key, (2, 4, 16, 16), dtype=jnp.float32)

    # EfficientDet usage: scale_factor=2, mode='nearest'
    out = interpolate2d(x, scale_factor=2.0, mode="nearest")
    out = jax.block_until_ready(out)

    assert out.shape == (2, 4, 32, 32), out.shape

    # Reference: for integer scale factor 2, nearest == repeat along H and W (bit-exact).
    ref = jnp.repeat(jnp.repeat(x, 2, axis=2), 2, axis=3)
    assert jnp.array_equal(out, ref), "mismatch vs nearest-neighbor reference"

    print("KERNEL_OK")
</pallas_src>

<mosaic_0001>
module attributes {stable_mosaic.version = 11 : i64} {
  func.func @kernel(%arg0: i32, %arg1: memref<8x16x16xf32, #tpu.memory_space<vmem>>, %arg2: memref<16x32xf32, #tpu.memory_space<vmem>>, %arg3: memref<8x1024xf32, #tpu.memory_space<vmem>>) attributes {dimension_semantics = [#tpu.dimension_semantics<parallel>], iteration_bounds = array<i64: 1>, scalar_prefetch = 0 : i64, scratch_operands = 0 : i64, tpu.core_type = #tpu.core_type<tc>, window_params = [{transform_indices = @transform_0, window_bounds = array<i64: 8, 16, 16>}, {pipeline_mode = #tpu.pipeline_mode<synchronous>, transform_indices = @transform_1, window_bounds = array<i64: 16, 32>}, {transform_indices = @transform_2, window_bounds = array<i64: 8, 1024>}]} {
    %c0 = arith.constant 0 : index
    %c0_0 = arith.constant 0 : index
    %0 = vector.load %arg2[%c0, %c0_0] : memref<16x32xf32, #tpu.memory_space<vmem>>, vector<16x32xf32>
    %c0_1 = arith.constant 0 : index
    %c0_2 = arith.constant 0 : index
    %c0_3 = arith.constant 0 : index
    %1 = vector.load %arg1[%c0_1, %c0_2, %c0_3] : memref<8x16x16xf32, #tpu.memory_space<vmem>>, vector<8x1x16xf32>
    %2 = vector.shape_cast %1 : vector<8x1x16xf32> to vector<8x16xf32>
    %cst = arith.constant dense<0.000000e+00> : vector<8x32xf32>
    %3 = tpu.matmul %2, %0, %cst {dimension_numbers = #tpu.dot_dimension_numbers<[1], [0], [0], [1], [0, 0, 1, 1], [], []>, precision = #tpu.contract_precision<fp32>} : vector<8x16xf32>, vector<16x32xf32>, vector<8x32xf32> -> vector<8x32xf32>
    %4 = tpu.concatenate %3, %3 in 1 : vector<8x32xf32>, vector<8x32xf32> -> vector<8x64xf32>
    %c0_4 = arith.constant 0 : index
    %c0_5 = arith.constant 0 : index
    %5 = vector.load %arg3[%c0_4, %c0_5] : memref<8x1024xf32, #tpu.memory_space<vmem>>, vector<8x64xf32>
    tpu.vector_store %arg3[%c0_4, %c0_5], %4 {strides = array<i32>} : memref<8x1024xf32, #tpu.memory_space<vmem>>, vector<8x64xf32>,
    %c0_6 = arith.constant 0 : index
    %c1 = arith.constant 1 : index
    %c0_7 = arith.constant 0 : index
    %6 = vector.load %arg1[%c0_6, %c1, %c0_7] : memref<8x16x16xf32, #tpu.memory_space<vmem>>, vector<8x1x16xf32>
    %7 = vector.shape_cast %6 : vector<8x1x16xf32> to vector<8x16xf32>
    %cst_8 = arith.constant dense<0.000000e+00> : vector<8x32xf32>
    %8 = tpu.matmul %7, %0, %cst_8 {dimension_numbers = #tpu.dot_dimension_numbers<[1], [0], [0], [1], [0, 0, 1, 1], [], []>, precision = #tpu.contract_precision<fp32>} : vector<8x16xf32>, vector<16x32xf32>, vector<8x32xf32> -> vector<8x32xf32>
    %9 = tpu.concatenate %8, %8 in 1 : vector<8x32xf32>, vector<8x32xf32> -> vector<8x64xf32>
    %c0_9 = arith.constant 0 : index
    %c64 = arith.constant 64 : index
    %10 = vector.load %arg3[%c0_9, %c64] : memref<8x1024xf32, #tpu.memory_space<vmem>>, vector<8x64xf32>
    tpu.vector_store %arg3[%c0_9, %c64], %9 {strides = array<i32>} : memref<8x1024xf32, #tpu.memory_space<vmem>>, vector<8x64xf32>,
    %c0_10 = arith.constant 0 : index
    %c2 = arith.constant 2 : index
    %c0_11 = arith.constant 0 : index
    %11 = vector.load %arg1[%c0_10, %c2, %c0_11] : memref<8x16x16xf32, #tpu.memory_space<vmem>>, vector<8x1x16xf32>
    %12 = vector.shape_cast %11 : vector<8x1x16xf32> to vector<8x16xf32>
    %cst_12 = arith.constant dense<0.000000e+00> : vector<8x32xf32>
    %13 = tpu.matmul %12, %0, %cst_12 {dimension_numbers = #tpu.dot_dimension_numbers<[1], [0], [0], [1], [0, 0, 1, 1], [], []>, precision = #tpu.contract_precision<fp32>} : vector<8x16xf32>, vector<16x32xf32>, vector<8x32xf32> -> vector<8x32xf32>
    %14 = tpu.concatenate %13, %13 in 1 : vector<8x32xf32>, vector<8x32xf32> -> vector<8x64xf32>
    %c0_13 = arith.constant 0 : index
    %c128 = arith.constant 128 : index
    %15 = vector.load %arg3[%c0_13, %c128] : memref<8x1024xf32, #tpu.memory_space<vmem>>, vector<8x64xf32>
    tpu.vector_store %arg3[%c0_13, %c128], %14 {strides = array<i32>} : memref<8x1024xf32, #tpu.memory_space<vmem>>, vector<8x64xf32>,
    %c0_14 = arith.constant 0 : index
    %c3 = arith.constant 3 : index
    %c0_15 = arith.constant 0 : index
    %16 = vector.load %arg1[%c0_14, %c3, %c0_15] : memref<8x16x16xf32, #tpu.memory_space<vmem>>, vector<8x1x16xf32>
    %17 = vector.shape_cast %16 : vector<8x1x16xf32> to vector<8x16xf32>
    %cst_16 = arith.constant dense<0.000000e+00> : vector<8x32xf32>
    %18 = tpu.matmul %17, %0, %cst_16 {dimension_numbers = #tpu.dot_dimension_numbers<[1], [0], [0], [1], [0, 0, 1, 1], [], []>, precision = #tpu.contract_precision<fp32>} : vector<8x16xf32>, vector<16x32xf32>, vector<8x32xf32> -> vector<8x32xf32>
    %19 = tpu.concatenate %18, %18 in 1 : vector<8x32xf32>, vector<8x32xf32> -> vector<8x64xf32>
    %c0_17 = arith.constant 0 : index
    %c192 = arith.constant 192 : index
    %20 = vector.load %arg3[%c0_17, %c192] : memref<8x1024xf32, #tpu.memory_space<vmem>>, vector<8x64xf32>
    tpu.vector_store %arg3[%c0_17, %c192], %19 {strides = array<i32>} : memref<8x1024xf32, #tpu.memory_space<vmem>>, vector<8x64xf32>,
    %c0_18 = arith.constant 0 : index
    %c4 = arith.constant 4 : index
    %c0_19 = arith.constant 0 : index
    %21 = vector.load %arg1[%c0_18, %c4, %c0_19] : memref<8x16x16xf32, #tpu.memory_space<vmem>>, vector<8x1x16xf32>
    %22 = vector.shape_cast %21 : vector<8x1x16xf32> to vector<8x16xf32>
    %cst_20 = arith.constant dense<0.000000e+00> : vector<8x32xf32>
    %23 = tpu.matmul %22, %0, %cst_20 {dimension_numbers = #tpu.dot_dimension_numbers<[1], [0], [0], [1], [0, 0, 1, 1], [], []>, precision = #tpu.contract_precision<fp32>} : vector<8x16xf32>, vector<16x32xf32>, vector<8x32xf32> -> vector<8x32xf32>
    %24 = tpu.concatenate %23, %23 in 1 : vector<8x32xf32>, vector<8x32xf32> -> vector<8x64xf32>
    %c0_21 = arith.constant 0 : index
    %c256 = arith.constant 256 : index
    %25 = vector.load %arg3[%c0_21, %c256] : memref<8x1024xf32, #tpu.memory_space<vmem>>, vector<8x64xf32>
    tpu.vector_store %arg3[%c0_21, %c256], %24 {strides = array<i32>} : memref<8x1024xf32, #tpu.memory_space<vmem>>, vector<8x64xf32>,
    %c0_22 = arith.constant 0 : index
    %c5 = arith.constant 5 : index
    %c0_23 = arith.constant 0 : index
    %26 = vector.load %arg1[%c0_22, %c5, %c0_23] : memref<8x16x16xf32, #tpu.memory_space<vmem>>, vector<8x1x16xf32>
    %27 = vector.shape_cast %26 : vector<8x1x16xf32> to vector<8x16xf32>
    %cst_24 = arith.constant dense<0.000000e+00> : vector<8x32xf32>
    %28 = tpu.matmul %27, %0, %cst_24 {dimension_numbers = #tpu.dot_dimension_numbers<[1], [0], [0], [1], [0, 0, 1, 1], [], []>, precision = #tpu.contract_precision<fp32>} : vector<8x16xf32>, vector<16x32xf32>, vector<8x32xf32> -> vector<8x32xf32>
    %29 = tpu.concatenate %28, %28 in 1 : vector<8x32xf32>, vector<8x32xf32> -> vector<8x64xf32>
    %c0_25 = arith.constant 0 : index
    %c320 = arith.constant 320 : index
    %30 = vector.load %arg3[%c0_25, %c320] : memref<8x1024xf32, #tpu.memory_space<vmem>>, vector<8x64xf32>
    tpu.vector_store %arg3[%c0_25, %c320], %29 {strides = array<i32>} : memref<8x1024xf32, #tpu.memory_space<vmem>>, vector<8x64xf32>,
    %c0_26 = arith.constant 0 : index
    %c6 = arith.constant 6 : index
    %c0_27 = arith.constant 0 : index
    %31 = vector.load %arg1[%c0_26, %c6, %c0_27] : memref<8x16x16xf32, #tpu.memory_space<vmem>>, vector<8x1x16xf32>
    %32 = vector.shape_cast %31 : vector<8x1x16xf32> to vector<8x16xf32>
    %cst_28 = arith.constant dense<0.000000e+00> : vector<8x32xf32>
    %33 = tpu.matmul %32, %0, %cst_28 {dimension_numbers = #tpu.dot_dimension_numbers<[1], [0], [0], [1], [0, 0, 1, 1], [], []>, precision = #tpu.contract_precision<fp32>} : vector<8x16xf32>, vector<16x32xf32>, vector<8x32xf32> -> vector<8x32xf32>
    %34 = tpu.concatenate %33, %33 in 1 : vector<8x32xf32>, vector<8x32xf32> -> vector<8x64xf32>
    %c0_29 = arith.constant 0 : index
    %c384 = arith.constant 384 : index
    %35 = vector.load %arg3[%c0_29, %c384] : memref<8x1024xf32, #tpu.memory_space<vmem>>, vector<8x64xf32>
    tpu.vector_store %arg3[%c0_29, %c384], %34 {strides = array<i32>} : memref<8x1024xf32, #tpu.memory_space<vmem>>, vector<8x64xf32>,
    %c0_30 = arith.constant 0 : index
    %c7 = arith.constant 7 : index
    %c0_31 = arith.constant 0 : index
    %36 = vector.load %arg1[%c0_30, %c7, %c0_31] : memref<8x16x16xf32, #tpu.memory_space<vmem>>, vector<8x1x16xf32>
    %37 = vector.shape_cast %36 : vector<8x1x16xf32> to vector<8x16xf32>
    %cst_32 = arith.constant dense<0.000000e+00> : vector<8x32xf32>
    %38 = tpu.matmul %37, %0, %cst_32 {dimension_numbers = #tpu.dot_dimension_numbers<[1], [0], [0], [1], [0, 0, 1, 1], [], []>, precision = #tpu.contract_precision<fp32>} : vector<8x16xf32>, vector<16x32xf32>, vector<8x32xf32> -> vector<8x32xf32>
    %39 = tpu.concatenate %38, %38 in 1 : vector<8x32xf32>, vector<8x32xf32> -> vector<8x64xf32>
    %c0_33 = arith.constant 0 : index
    %c448 = arith.constant 448 : index
    %40 = vector.load %arg3[%c0_33, %c448] : memref<8x1024xf32, #tpu.memory_space<vmem>>, vector<8x64xf32>
    tpu.vector_store %arg3[%c0_33, %c448], %39 {strides = array<i32>} : memref<8x1024xf32, #tpu.memory_space<vmem>>, vector<8x64xf32>,
    %c0_34 = arith.constant 0 : index
    %c8 = arith.constant 8 : index
    %c0_35 = arith.constant 0 : index
    %41 = vector.load %arg1[%c0_34, %c8, %c0_35] : memref<8x16x16xf32, #tpu.memory_space<vmem>>, vector<8x1x16xf32>
    %42 = vector.shape_cast %41 : vector<8x1x16xf32> to vector<8x16xf32>
    %cst_36 = arith.constant dense<0.000000e+00> : vector<8x32xf32>
    %43 = tpu.matmul %42, %0, %cst_36 {dimension_numbers = #tpu.dot_dimension_numbers<[1], [0], [0], [1], [0, 0, 1, 1], [], []>, precision = #tpu.contract_precision<fp32>} : vector<8x16xf32>, vector<16x32xf32>, vector<8x32xf32> -> vector<8x32xf32>
    %44 = tpu.concatenate %43, %43 in 1 : vector<8x32xf32>, vector<8x32xf32> -> vector<8x64xf32>
    %c0_37 = arith.constant 0 : index
    %c512 = arith.constant 512 : index
    %45 = vector.load %arg3[%c0_37, %c512] : memref<8x1024xf32, #tpu.memory_space<vmem>>, vector<8x64xf32>
    tpu.vector_store %arg3[%c0_37, %c512], %44 {strides = array<i32>} : memref<8x1024xf32, #tpu.memory_space<vmem>>, vector<8x64xf32>,
    %c0_38 = arith.constant 0 : index
    %c9 = arith.constant 9 : index
    %c0_39 = arith.constant 0 : index
    %46 = vector.load %arg1[%c0_38, %c9, %c0_39] : memref<8x16x16xf32, #tpu.memory_space<vmem>>, vector<8x1x16xf32>
    %47 = vector.shape_cast %46 : vector<8x1x16xf32> to vector<8x16xf32>
    %cst_40 = arith.constant dense<0.000000e+00> : vector<8x32xf32>
    %48 = tpu.matmul %47, %0, %cst_40 {dimension_numbers = #tpu.dot_dimension_numbers<[1], [0], [0], [1], [0, 0, 1, 1], [], []>, precision = #tpu.contract_precision<fp32>} : vector<8x16xf32>, vector<16x32xf32>, vector<8x32xf32> -> vector<8x32xf32>
    %49 = tpu.concatenate %48, %48 in 1 : vector<8x32xf32>, vector<8x32xf32> -> vector<8x64xf32>
    %c0_41 = arith.constant 0 : index
    %c576 = arith.constant 576 : index
    %50 = vector.load %arg3[%c0_41, %c576] : memref<8x1024xf32, #tpu.memory_space<vmem>>, vector<8x64xf32>
    tpu.vector_store %arg3[%c0_41, %c576], %49 {strides = array<i32>} : memref<8x1024xf32, #tpu.memory_space<vmem>>, vector<8x64xf32>,
    %c0_42 = arith.constant 0 : index
    %c10 = arith.constant 10 : index
    %c0_43 = arith.constant 0 : index
    %51 = vector.load %arg1[%c0_42, %c10, %c0_43] : memref<8x16x16xf32, #tpu.memory_space<vmem>>, vector<8x1x16xf32>
    %52 = vector.shape_cast %51 : vector<8x1x16xf32> to vector<8x16xf32>
    %cst_44 = arith.constant dense<0.000000e+00> : vector<8x32xf32>
    %53 = tpu.matmul %52, %0, %cst_44 {dimension_numbers = #tpu.dot_dimension_numbers<[1], [0], [0], [1], [0, 0, 1, 1], [], []>, precision = #tpu.contract_precision<fp32>} : vector<8x16xf32>, vector<16x32xf32>, vector<8x32xf32> -> vector<8x32xf32>
    %54 = tpu.concatenate %53, %53 in 1 : vector<8x32xf32>, vector<8x32xf32> -> vector<8x64xf32>
    %c0_45 = arith.constant 0 : index
    %c640 = arith.constant 640 : index
    %55 = vector.load %arg3[%c0_45, %c640] : memref<8x1024xf32, #tpu.memory_space<vmem>>, vector<8x64xf32>
    tpu.vector_store %arg3[%c0_45, %c640], %54 {strides = array<i32>} : memref<8x1024xf32, #tpu.memory_space<vmem>>, vector<8x64xf32>,
    %c0_46 = arith.constant 0 : index
    %c11 = arith.constant 11 : index
    %c0_47 = arith.constant 0 : index
    %56 = vector.load %arg1[%c0_46, %c11, %c0_47] : memref<8x16x16xf32, #tpu.memory_space<vmem>>, vector<8x1x16xf32>
    %57 = vector.shape_cast %56 : vector<8x1x16xf32> to vector<8x16xf32>
    %cst_48 = arith.constant dense<0.000000e+00> : vector<8x32xf32>
    %58 = tpu.matmul %57, %0, %cst_48 {dimension_numbers = #tpu.dot_dimension_numbers<[1], [0], [0], [1], [0, 0, 1, 1], [], []>, precision = #tpu.contract_precision<fp32>} : vector<8x16xf32>, vector<16x32xf32>, vector<8x32xf32> -> vector<8x32xf32>
    %59 = tpu.concatenate %58, %58 in 1 : vector<8x32xf32>, vector<8x32xf32> -> vector<8x64xf32>
    %c0_49 = arith.constant 0 : index
    %c704 = arith.constant 704 : index
    %60 = vector.load %arg3[%c0_49, %c704] : memref<8x1024xf32, #tpu.memory_space<vmem>>, vector<8x64xf32>
    tpu.vector_store %arg3[%c0_49, %c704], %59 {strides = array<i32>} : memref<8x1024xf32, #tpu.memory_space<vmem>>, vector<8x64xf32>,
    %c0_50 = arith.constant 0 : index
    %c12 = arith.constant 12 : index
    %c0_51 = arith.constant 0 : index
    %61 = vector.load %arg1[%c0_50, %c12, %c0_51] : memref<8x16x16xf32, #tpu.memory_space<vmem>>, vector<8x1x16xf32>
    %62 = vector.shape_cast %61 : vector<8x1x16xf32> to vector<8x16xf32>
    %cst_52 = arith.constant dense<0.000000e+00> : vector<8x32xf32>
    %63 = tpu.matmul %62, %0, %cst_52 {dimension_numbers = #tpu.dot_dimension_numbers<[1], [0], [0], [1], [0, 0, 1, 1], [], []>, precision = #tpu.contract_precision<fp32>} : vector<8x16xf32>, vector<16x32xf32>, vector<8x32xf32> -> vector<8x32xf32>
    %64 = tpu.concatenate %63, %63 in 1 : vector<8x32xf32>, vector<8x32xf32> -> vector<8x64xf32>
    %c0_53 = arith.constant 0 : index
    %c768 = arith.constant 768 : index
    %65 = vector.load %arg3[%c0_53, %c768] : memref<8x1024xf32, #tpu.memory_space<vmem>>, vector<8x64xf32>
    tpu.vector_store %arg3[%c0_53, %c768], %64 {strides = array<i32>} : memref<8x1024xf32, #tpu.memory_space<vmem>>, vector<8x64xf32>,
    %c0_54 = arith.constant 0 : index
    %c13 = arith.constant 13 : index
    %c0_55 = arith.constant 0 : index
    %66 = vector.load %arg1[%c0_54, %c13, %c0_55] : memref<8x16x16xf32, #tpu.memory_space<vmem>>, vector<8x1x16xf32>
    %67 = vector.shape_cast %66 : vector<8x1x16xf32> to vector<8x16xf32>
    %cst_56 = arith.constant dense<0.000000e+00> : vector<8x32xf32>
    %68 = tpu.matmul %67, %0, %cst_56 {dimension_numbers = #tpu.dot_dimension_numbers<[1], [0], [0], [1], [0, 0, 1, 1], [], []>, precision = #tpu.contract_precision<fp32>} : vector<8x16xf32>, vector<16x32xf32>, vector<8x32xf32> -> vector<8x32xf32>
    %69 = tpu.concatenate %68, %68 in 1 : vector<8x32xf32>, vector<8x32xf32> -> vector<8x64xf32>
    %c0_57 = arith.constant 0 : index
    %c832 = arith.constant 832 : index
    %70 = vector.load %arg3[%c0_57, %c832] : memref<8x1024xf32, #tpu.memory_space<vmem>>, vector<8x64xf32>
    tpu.vector_store %arg3[%c0_57, %c832], %69 {strides = array<i32>} : memref<8x1024xf32, #tpu.memory_space<vmem>>, vector<8x64xf32>,
    %c0_58 = arith.constant 0 : index
    %c14 = arith.constant 14 : index
    %c0_59 = arith.constant 0 : index
    %71 = vector.load %arg1[%c0_58, %c14, %c0_59] : memref<8x16x16xf32, #tpu.memory_space<vmem>>, vector<8x1x16xf32>
    %72 = vector.shape_cast %71 : vector<8x1x16xf32> to vector<8x16xf32>
    %cst_60 = arith.constant dense<0.000000e+00> : vector<8x32xf32>
    %73 = tpu.matmul %72, %0, %cst_60 {dimension_numbers = #tpu.dot_dimension_numbers<[1], [0], [0], [1], [0, 0, 1, 1], [], []>, precision = #tpu.contract_precision<fp32>} : vector<8x16xf32>, vector<16x32xf32>, vector<8x32xf32> -> vector<8x32xf32>
    %74 = tpu.concatenate %73, %73 in 1 : vector<8x32xf32>, vector<8x32xf32> -> vector<8x64xf32>
    %c0_61 = arith.constant 0 : index
    %c896 = arith.constant 896 : index
    %75 = vector.load %arg3[%c0_61, %c896] : memref<8x1024xf32, #tpu.memory_space<vmem>>, vector<8x64xf32>
    tpu.vector_store %arg3[%c0_61, %c896], %74 {strides = array<i32>} : memref<8x1024xf32, #tpu.memory_space<vmem>>, vector<8x64xf32>,
    %c0_62 = arith.constant 0 : index
    %c15 = arith.constant 15 : index
    %c0_63 = arith.constant 0 : index
    %76 = vector.load %arg1[%c0_62, %c15, %c0_63] : memref<8x16x16xf32, #tpu.memory_space<vmem>>, vector<8x1x16xf32>
    %77 = vector.shape_cast %76 : vector<8x1x16xf32> to vector<8x16xf32>
    %cst_64 = arith.constant dense<0.000000e+00> : vector<8x32xf32>
    %78 = tpu.matmul %77, %0, %cst_64 {dimension_numbers = #tpu.dot_dimension_numbers<[1], [0], [0], [1], [0, 0, 1, 1], [], []>, precision = #tpu.contract_precision<fp32>} : vector<8x16xf32>, vector<16x32xf32>, vector<8x32xf32> -> vector<8x32xf32>
    %79 = tpu.concatenate %78, %78 in 1 : vector<8x32xf32>, vector<8x32xf32> -> vector<8x64xf32>
    %c0_65 = arith.constant 0 : index
    %c960 = arith.constant 960 : index
    %80 = vector.load %arg3[%c0_65, %c960] : memref<8x1024xf32, #tpu.memory_space<vmem>>, vector<8x64xf32>
    tpu.vector_store %arg3[%c0_65, %c960], %79 {strides = array<i32>} : memref<8x1024xf32, #tpu.memory_space<vmem>>, vector<8x64xf32>,
    return
  }
  func.func @transform_0(%arg0: i32) -> (i32, i32, i32) {
    %c0_i32 = arith.constant 0 : i32
    %c0_i32_0 = arith.constant 0 : i32
    %c0_i32_1 = arith.constant 0 : i32
    return %arg0, %c0_i32, %c0_i32_0 : i32, i32, i32
  }
  func.func @transform_1(%arg0: i32) -> (i32, i32) {
    %c0_i32 = arith.constant 0 : i32
    %c0_i32_0 = arith.constant 0 : i32
    %c0_i32_1 = arith.constant 0 : i32
    return %c0_i32, %c0_i32_0 : i32, i32
  }
  func.func @transform_2(%arg0: i32) -> (i32, i32) {
    %c0_i32 = arith.constant 0 : i32
    %c0_i32_0 = arith.constant 0 : i32
    return %arg0, %c0_i32 : i32, i32
  }
}

</mosaic_0001>

<bundles_post_ra>
// kernel: tpu_custom_call.1
= control target key start
LH: loop header
LB: loop body
LE: loop exit
PB: predicated region body
PF: predicated region fallthrough
CT: control target
= control target key end

     0   :  { %7 = vsyncpa [#allocation3], 0  ;;  %s3948_s0 = inlined_call_operand.hbm [shape: f32[8,16,16], index: 0, kind: input, shape index: {}]   ;;  %s3949_s1 = inlined_call_operand.hbm [shape: f32[16,32], index: 1, kind: input, shape index: {}]   ;;  %s3950_s2 = inlined_call_operand.hbm [shape: f32[8,1024], index: 2, kind: output, shape index: {}]  }
   0x1   :  { %8 = vsyncpa [#allocation6], 0 }
   0x2   :  { %9 = vsyncpa [#allocation4], 0  ;;  %s14_s11 = sshll.u32 %s3948_s0, 4  ;;  %s3344_s12 = smov [#allocation2]   ;;  %s15_s11 = int_to_ptr.hbm [resolvable:$true] %s14_s11 }
   0x3   :  { %s16_s13 = sshll.u32 %s3344_s12, 4  ;;  %s27_s16 = sshll.u32 %s3949_s1, 4  ;;  %s17_s13 = int_to_ptr.vmem [resolvable:$true] %s16_s13  ;;  %s28_s16 = int_to_ptr.hbm [resolvable:$true] %s27_s16 }
   0x4   :  { %s3345_s17 = smov 128   ;;  %s3346_s18 = smov 8  }
   0x5   :  { %22 = dma.hbm_to_vmem [thread:$0]  %s15_s11, 2048, %s17_s13, [#allocation3], %s3345_s17, %s3345_s17, %s3346_s18  }
   0x6   :  { %s3347_s19 = smov [#allocation5]  }
   0x7   :  { %s29_s20 = sshll.u32 %s3347_s19, 4  ;;  %s30_s20 = int_to_ptr.vmem [resolvable:$true] %s29_s20 }
   0x8   :  { %35 = dma.hbm_to_vmem [thread:$0]  %s28_s16, 256, %s30_s20, [#allocation6], %s3345_s17, %s3345_s17, %s3346_s18  }
   0x9   :  { %3338 = dma.done.wait [#allocation3], 2048  }
   0xa   :  { %3339 = vsyncadd [#allocation3], 4294965248 }
   0xb   :  { %3340 = dma.done.wait [#allocation6], 256  }
   0xc   :  { %3341 = vsyncadd [#allocation6], 4294967040  ;;  %vm63_vm0 = vcmask 1041409   ;;  %vm66_vm1 = vcmask 1042434   ;;  %vm69_vm2 = vcmask 1043459   ;;  %vm72_vm3 = vcmask 1044484  }
   0xd   :  { %vm75_vm4 = vcmask 1045509   ;;  %v45_v0 = vld [vmem:[#allocation5 + $0x8] sm:$0xff]  ;;  %v44_v1 = vld [vmem:[#allocation5] sm:$0xff]  ;;  %vm78_vm5 = vcmask 1046534   ;;  %vm81_vm6 = vcmask 1047559   ;;  %vm83_vm7 = vcmask 130048  }
   0xe   :  { %v46_v2 = vld [vmem:[#allocation2] sm:$0x1]  ;;  %v3372_v3 = vand.u32 4294901760, %v45_v0  ;;  %v3374_v4 = vand.u32 4294901760, %v44_v1  ;;  %v47_v5 = vld [vmem:[#allocation2 + $0x10] sm:$0x1] }
   0xf   :  { %v48_v6 = vld [vmem:[#allocation2 + $0x20] sm:$0x1]  ;;  %v49_v7 = vld [vmem:[#allocation2 + $0x30] sm:$0x1]  ;;  %v62_v14 = vrot.slane %v47_v5, 7  ;;  %s3348_s0 = smov 32  }
  0x10   :  { %v50_v8 = vld [vmem:[#allocation2 + $0x40] sm:$0x1]  ;;  %v51_v9 = vld [vmem:[#allocation2 + $0x50] sm:$0x1]  ;;  %v3377_v10 = vsub.f32 %v45_v0, %v3372_v3  ;;  %v3380_v11 = vsub.f32 %v44_v1, %v3374_v4  ;;  %185 = vmatpush.msra.mxu3 %v3372_v3  ;;  %v65_v15 = vrot.slane %v48_v6, 6  ;;  %101 = vmatpush.msra.mxu0 %v3372_v3  ;;  %v68_v16 = vrot.slane %v49_v7, 5 }
  0x11   :  { %v52_v12 = vld [vmem:[#allocation2 + $0x60] sm:$0x1]  ;;  %v53_v13 = vld [vmem:[#allocation2 + $0x70] sm:$0x1]  ;;  %v71_v17 = vrot.slane %v50_v8, 4  ;;  %v74_v18 = vrot.slane %v51_v9, 3  ;;  %v64_v20 = vsel %vm63_vm0, %v62_v14, %v46_v2 }
  0x12   :  { %v77_v19 = vrot.slane %v52_v12, 2  ;;  %160 = vmatpush.msra.mxu2 %v3377_v10  ;;  %v80_v21 = vrot.slane %v53_v13, 1  ;;  %v3387_v22 = vand.u32 4294901760, %v3377_v10  ;;  %187 = vmatpush.msra.mxu3 %v3374_v4  ;;  %v3391_v23 = vand.u32 4294901760, %v3380_v11  ;;  %v253_v24 = vld [vmem:[#allocation2 + $0x1] sm:$0x1] }
  0x13   :  { %v254_v25 = vld [vmem:[#allocation2 + $0x11] sm:$0x1]  ;;  %v67_v26 = vsel %vm66_vm1, %v65_v15, %v64_v20  ;;  %103 = vmatpush.msra.mxu0 %v3374_v4  ;;  %v255_v27 = vld [vmem:[#allocation2 + $0x21] sm:$0x1]  ;;  %v455_v40 = vld [vmem:[#allocation2 + $0x2] sm:$0x1] }
  0x14   :  { %v256_v28 = vld [vmem:[#allocation2 + $0x31] sm:$0x1]  ;;  %v257_v29 = vld [vmem:[#allocation2 + $0x41] sm:$0x1]  ;;  %163 = vmatpush.msra.mxu2 %v3380_v11  ;;  %v70_v30 = vsel %vm69_vm2, %v68_v16, %v67_v26  ;;  %v130_v31 = vsub.f32 %v3377_v10, %v3387_v22  ;;  %v136_v32 = vsub.f32 %v3380_v11, %v3391_v23  ;;  %v269_v37 = vrot.slane %v254_v25, 7  ;;  %s3349_s1 = smov 64  }
  0x15   :  { %212 = vmatpush.msrb.mxu0 %v3387_v22  ;;  %v258_v33 = vld [vmem:[#allocation2 + $0x51] sm:$0x1]  ;;  %v259_v34 = vld [vmem:[#allocation2 + $0x61] sm:$0x1]  ;;  %v73_v36 = vsel %vm72_vm3, %v71_v17, %v70_v30  ;;  %v271_v38 = vrot.slane %v255_v27, 6  ;;  %v273_v39 = vrot.slane %v256_v28, 5 }
  0x16   :  { %v260_v35 = vld [vmem:[#allocation2 + $0x71] sm:$0x1]  ;;  %300 = vmatpush.msrb.mxu2 %v3372_v3  ;;  %v76_v41 = vsel %vm75_vm4, %v74_v18, %v73_v36  ;;  %v3405_v42 = vand.u32 4294901760, %v130_v31  ;;  %v3407_v43 = vand.u32 4294901760, %v136_v32  ;;  %v275_v44 = vrot.slane %v257_v29, 4  ;;  %s3350_s21 = smov [#allocation7]  }
  0x17   :  { %216 = vmatpush.msrb.mxu0 %v3391_v23  ;;  %v456_v45 = vld [vmem:[#allocation2 + $0x12] sm:$0x1]  ;;  %v79_v46 = vsel %vm78_vm5, %v77_v19, %v76_v41  ;;  %v270_v47 = vsel %vm63_vm0, %v269_v37, %v253_v24  ;;  %v277_v48 = vrot.slane %v258_v33, 3  ;;  %v457_v49 = vld [vmem:[#allocation2 + $0x22] sm:$0x1]  ;;  %v279_v53 = vrot.slane %v259_v34, 2 }
  0x18   :  { %302 = vmatpush.msrb.mxu2 %v3374_v4  ;;  %v458_v50 = vld [vmem:[#allocation2 + $0x32] sm:$0x1]  ;;  %v82_v51 = vsel %vm81_vm6, %v80_v21, %v79_v46  ;;  %132 = vmatpush.msra.mxu1 %v3405_v42  ;;  %v272_v52 = vsel %vm66_vm1, %v271_v38, %v270_v47  ;;  %v459_v54 = vld [vmem:[#allocation2 + $0x42] sm:$0x1]  ;;  %v471_v56 = vrot.slane %v456_v45, 7  ;;  %v281_v59 = vrot.slane %v260_v35, 1 }
  0x19   :  { %331 = vmatpush.msrb.mxu3 %v3405_v42  ;;  %v460_v55 = vld [vmem:[#allocation2 + $0x52] sm:$0x1]  ;;  %v84_v57 = vsel %vm83_vm7, %v82_v51, 0  ;;  %v274_v58 = vsel %vm69_vm2, %v273_v39, %v272_v52  ;;  %v461_v60 = vld [vmem:[#allocation2 + $0x62] sm:$0x1]  ;;  %v473_v61 = vrot.slane %v457_v49, 6 }
  0x1a   :  { %v3419_v62 = vand.u32 4294901760, %v84_v57  ;;  %138 = vmatpush.msra.mxu1 %v3407_v43  ;;  %v276_v63 = vsel %vm72_vm3, %v275_v44, %v274_v58  ;;  %v462_v0 = vld [vmem:[#allocation2 + $0x72] sm:$0x1]  ;;  %v472_v1 = vsel %vm63_vm0, %v471_v56, %v455_v40  ;;  %v475_v2 = vrot.slane %v458_v50, 5  ;;  %v653_v5 = vld [vmem:[#allocation2 + $0x13] sm:$0x1] }
  0x1b   :  { %337 = vmatpush.msrb.mxu3 %v3407_v43  ;;  %v278_v6 = vsel %vm75_vm4, %v277_v48, %v276_v63  ;;  %v474_v7 = vsel %vm66_vm1, %v473_v61, %v472_v1  ;;  %v477_v8 = vrot.slane %v459_v54, 4  ;;  %v479_v9 = vrot.slane %v460_v55, 3  ;;  %v654_v12 = vld [vmem:[#allocation2 + $0x23] sm:$0x1]  ;;  %v655_v18 = vld [vmem:[#allocation2 + $0x33] sm:$0x1] }
  0x1c   :  { %237 = vmatpush.msrb.mxu1 %v3372_v3  ;;  %v105_v13 = vsub.f32 %v84_v57, %v3419_v62  ;;  %v280_v14 = vsel %vm78_vm5, %v279_v53, %v278_v6  ;;  %v476_v15 = vsel %vm69_vm2, %v475_v2, %v474_v7  ;;  %v481_v16 = vrot.slane %v461_v60, 2  ;;  %v652_v17 = vld [vmem:[#allocation2 + $0x3] sm:$0x1]  ;;  %v657_v29 = vld [vmem:[#allocation2 + $0x53] sm:$0x1]  ;;  %s3246_s22 = sshll.u32 %s3350_s21, 4  ;;  %s3247_s22 = int_to_ptr.vmem [resolvable:$true] %s3246_s22 }
  0x1d   :  { %140 = vmatmul.f32.vlgmr.msra.gmra.mxu1 %v3419_v62  ;;  %v282_v19 = vsel %vm81_vm6, %v281_v59, %v280_v14  ;;  %v478_v20 = vsel %vm72_vm3, %v477_v8, %v476_v15  ;;  %v483_v21 = vrot.slane %v462_v0, 1  ;;  %v656_v24 = vld [vmem:[#allocation2 + $0x43] sm:$0x1]  ;;  %v668_v25 = vrot.slane %v653_v5, 7  ;;  %v659_v37 = vld [vmem:[#allocation2 + $0x73] sm:$0x1] }
  0x1e   :  { %239 = vmatpush.msrb.mxu1 %v3374_v4  ;;  %166 = vmatmul.f32.vlgmr.msra.gmra.mxu2 %v105_v13  ;;  %v106_v26 = vand.u32 4294901760, %v105_v13  ;;  %v283_v27 = vsel %vm83_vm7, %v282_v19, 0  ;;  %v480_v28 = vsel %vm75_vm4, %v479_v9, %v478_v20  ;;  %v670_v30 = vrot.slane %v654_v12, 6  ;;  %v658_v33 = vld [vmem:[#allocation2 + $0x63] sm:$0x1]  ;;  %s3248_s25 = sshll.u32 %s3950_s2, 4  ;;  %s3249_s25 = int_to_ptr.hbm [resolvable:$true] %s3248_s25 }
  0x1f   :  { %v3438_v31 = vand.u32 4294901760, %v283_v27  ;;  %411 = vmatpush.msra.mxu2 %v3387_v22  ;;  %v482_v32 = vsel %vm78_vm5, %v481_v16, %v480_v28  ;;  %v669_v34 = vsel %vm63_vm0, %v668_v25, %v652_v17  ;;  %v672_v35 = vrot.slane %v655_v18, 5  ;;  %v854_v45 = vld [vmem:[#allocation2 + $0x14] sm:$0x1]  ;;  %v855_v54 = vld [vmem:[#allocation2 + $0x24] sm:$0x1] }
  0x20   :  { %384 = vmatpush.msra.mxu1 %v3372_v3  ;;  %191 = vmatmul.f32.vlgmr.msra.gmra.mxu3 %v106_v26  ;;  %v107_v36 = vsub.f32 %v105_v13, %v106_v26  ;;  %v671_v38 = vsel %vm66_vm1, %v670_v30, %v669_v34  ;;  %v674_v39 = vrot.slane %v656_v24, 4  ;;  %v676_v44 = vrot.slane %v657_v29, 3  ;;  %v853_v58 = vld [vmem:[#allocation2 + $0x4] sm:$0x1]  ;;  %v1051_v59 = vld [vmem:[#allocation2 + $0x15] sm:$0x1] }
  0x21   :  { %v3446_v40 = vsub.f32 %v283_v27, %v3438_v31  ;;  %436 = vmatpush.msra.mxu3 %v3372_v3  ;;  %415 = vmatpush.msra.mxu2 %v3391_v23  ;;  %v673_v41 = vsel %vm69_vm2, %v672_v35, %v671_v38  ;;  %v484_v47 = vsel %vm81_vm6, %v483_v21, %v482_v32  ;;  %v678_v49 = vrot.slane %v658_v33, 2  ;;  %v856_v63 = vld [vmem:[#allocation2 + $0x34] sm:$0x1]  ;;  %v1052_v5 = vld [vmem:[#allocation2 + $0x25] sm:$0x1] }
  0x22   :  { %386 = vmatpush.msra.mxu1 %v3374_v4  ;;  %v108_v46 = vand.u32 4294901760, %v107_v36  ;;  %v675_v48 = vsel %vm72_vm3, %v674_v39, %v673_v41  ;;  %v680_v52 = vrot.slane %v659_v37, 1  ;;  %v869_v55 = vrot.slane %v854_v45, 7  ;;  %v857_v8 = vld [vmem:[#allocation2 + $0x44] sm:$0x1] }
  0x23   :  { %v305_v50 = vand.u32 4294901760, %v3446_v40  ;;  %438 = vmatpush.msra.mxu3 %v3374_v4  ;;  %v677_v51 = vsel %vm75_vm4, %v676_v44, %v675_v48  ;;  %v485_v57 = vsel %vm83_vm7, %v484_v47, 0  ;;  %v871_v0 = vrot.slane %v855_v54, 6  ;;  %v1050_v12 = vld [vmem:[#allocation2 + $0x5] sm:$0x1] }
  0x24   :  { %109 = vmatmul.f32.vlgmr.msra.gmra.mxu0 %v108_v46  ;;  %v679_v53 = vsel %vm78_vm5, %v678_v49, %v677_v51  ;;  %v3466_v1 = vand.u32 4294901760, %v485_v57  ;;  %v870_v2 = vsel %vm63_vm0, %v869_v55, %v853_v58  ;;  %v1066_v6 = vrot.slane %v1051_v59, 7  ;;  %v1053_v15 = vld [vmem:[#allocation2 + $0x35] sm:$0x1]  ;;  %v858_v18 = vld [vmem:[#allocation2 + $0x54] sm:$0x1] }
  0x25   :  { %241 = vmatmul.f32.vlgmr.msrb.gmra.mxu1 %v3419_v62  ;;  %v306_v56 = vsub.f32 %v3446_v40, %v305_v50  ;;  %359 = vmatpush.msra.mxu0 %v3377_v10  ;;  %v681_v61 = vsel %vm81_vm6, %v680_v52, %v679_v53  ;;  %v873_v9 = vrot.slane %v856_v63, 5  ;;  %v872_v13 = vsel %vm66_vm1, %v871_v0, %v870_v2  ;;  %v859_v26 = vld [vmem:[#allocation2 + $0x64] sm:$0x1]  ;;  %v1055_v32 = vld [vmem:[#allocation2 + $0x55] sm:$0x1] }
  0x26   :  { %533 = vmatpush.msrb.mxu1 %v3405_v42  ;;  %v682_v7 = vsel %vm83_vm7, %v681_v61, 0  ;;  %v506_v14 = vsub.f32 %v485_v57, %v3466_v1  ;;  %v1068_v16 = vrot.slane %v1052_v5, 6  ;;  %v875_v19 = vrot.slane %v857_v8, 4  ;;  %v860_v34 = vld [vmem:[#allocation2 + $0x74] sm:$0x1] }
  0x27   :  { %v307_v60 = vand.u32 4294901760, %v306_v56  ;;  %362 = vmatpush.msra.mxu0 %v3380_v11  ;;  %v3478_v17 = vand.u32 4294901760, %v682_v7  ;;  %v1067_v20 = vsel %vm63_vm0, %v1066_v6, %v1050_v12  ;;  %v874_v21 = vsel %vm69_vm2, %v873_v9, %v872_v13  ;;  %v1056_v39 = vld [vmem:[#allocation2 + $0x65] sm:$0x1]  ;;  %v1057_v47 = vld [vmem:[#allocation2 + $0x75] sm:$0x1] }
  0x28   :  { %539 = vmatpush.msrb.mxu1 %v3407_v43  ;;  %339 = vmatmul.f32.vlgmr.msrb.gmra.mxu3 %v3438_v31  ;;  %v1070_v24 = vrot.slane %v1053_v15, 5  ;;  %v507_v25 = vand.u32 4294901760, %v506_v14  ;;  %v877_v27 = vrot.slane %v858_v18, 3  ;;  %v1069_v28 = vsel %vm66_vm1, %v1068_v16, %v1067_v20  ;;  %v1252_v51 = vld [vmem:[#allocation2 + $0x16] sm:$0x1] }
  0x29   :  { %308 = vmatmul.f32.vlgmr.msrb.gmra.mxu2 %v307_v60  ;;  %586 = vmatpush.msrb.mxu3 %v3372_v3  ;;  %v3490_v29 = vsub.f32 %v682_v7, %v3478_v17  ;;  %v876_v30 = vsel %vm72_vm3, %v875_v19, %v874_v21  ;;  %v879_v35 = vrot.slane %v859_v26, 2  ;;  %v1074_v41 = vrot.slane %v1055_v32, 3  ;;  %v1253_v55 = vld [vmem:[#allocation2 + $0x26] sm:$0x1]  ;;  %v1449_v60 = vld [vmem:[#allocation2 + $0x17] sm:$0x1] }
  0x2a   :  { %561 = vmatpush.msrb.mxu2 %v3377_v10  ;;  %v1071_v36 = vsel %vm69_vm2, %v1070_v24, %v1069_v28  ;;  %v878_v37 = vsel %vm75_vm4, %v877_v27, %v876_v30  ;;  %v881_v44 = vrot.slane %v860_v34, 1  ;;  %v1076_v48 = vrot.slane %v1056_v39, 2  ;;  %v1251_v59 = vld [vmem:[#allocation2 + $0x6] sm:$0x1]  ;;  %v1254_v63 = vld [vmem:[#allocation2 + $0x36] sm:$0x1] }
  0x2b   :  { %588 = vmatpush.msrb.mxu3 %v3374_v4  ;;  %v704_v38 = vand.u32 4294901760, %v3490_v29  ;;  %v1078_v53 = vrot.slane %v1057_v47, 1  ;;  %v1267_v56 = vrot.slane %v1252_v51, 7  ;;  %v1269_v0 = vrot.slane %v1253_v55, 6  ;;  %v1450_v6 = vld [vmem:[#allocation2 + $0x27] sm:$0x1] }
  0x2c   :  { %218 = vmatmul.f32.vlgmr.msrb.gmra.mxu0 %v3419_v62  ;;  %564 = vmatpush.msrb.mxu2 %v3380_v11  ;;  %v1054_v62 = vld [vmem:[#allocation2 + $0x45] sm:$0x1]  ;;  %v1464_v7 = vrot.slane %v1449_v60, 7  ;;  %v1255_v9 = vld [vmem:[#allocation2 + $0x46] sm:$0x1]  ;;  %v1271_v12 = vrot.slane %v1254_v63, 5 }
  0x2d   :  { %390 = vmatmul.f32.vlgmr.msra.gmra.mxu1 %v305_v50  ;;  %502 = vmatpush.msrb.mxu0 %v3372_v3  ;;  %v1072_v33 = vrot.slane %v1054_v62, 4  ;;  %v705_v49 = vsub.f32 %v3490_v29, %v704_v38  ;;  %v1268_v5 = vsel %vm63_vm0, %v1267_v56, %v1251_v59  ;;  %v1448_v13 = vld [vmem:[#allocation2 + $0x7] sm:$0x1]  ;;  %v1451_v16 = vld [vmem:[#allocation2 + $0x37] sm:$0x1]  ;;  %v1466_v18 = vrot.slane %v1450_v6, 6 }
  0x2e   :  { %638 = vmatpush.msra.mxu1 %v3372_v3  ;;  %v1256_v20 = vld [vmem:[#allocation2 + $0x56] sm:$0x1]  ;;  %v1273_v21 = vrot.slane %v1255_v9, 4  ;;  %v1465_v62 = vsel %vm63_vm0, %v1464_v7, %v1448_v13  ;;  %v1257_v27 = vld [vmem:[#allocation2 + $0x66] sm:$0x1]  ;;  %vm249_vm8 = vcmask 261120  }
  0x2f   :  { %504 = vmatpush.msrb.mxu0 %v3374_v4  ;;  %v1073_v45 = vsel %vm72_vm3, %v1072_v33, %v1071_v36  ;;  %v706_v57 = vand.u32 4294901760, %v705_v49  ;;  %v1275_v28 = vrot.slane %v1256_v20, 3  ;;  %v1467_v30 = vsel %vm66_vm1, %v1466_v18, %v1465_v62  ;;  %v1453_v34 = vld [vmem:[#allocation2 + $0x57] sm:$0x1]  ;;  %v1258_v36 = vld [vmem:[#allocation2 + $0x76] sm:$0x1] }
  0x30   :  { %440 = vmatmul.f32.vlgmr.msra.gmra.mxu3 %v3438_v31  ;;  %640 = vmatpush.msra.mxu1 %v3374_v4  ;;  %v1075_v50 = vsel %vm75_vm4, %v1074_v41, %v1073_v45  ;;  %v1454_v41 = vld [vmem:[#allocation2 + $0x67] sm:$0x1]  ;;  %v1279_v45 = vrot.slane %v1258_v36, 1  ;;  %v1455_v47 = vld [vmem:[#allocation2 + $0x77] sm:$0x1]  ;;  %vm251_vm9 = vcmask 523264  }
  0x31   :  { %417 = vmatmul.f32.vlgmr.msra.gmra.mxu2 %v3438_v31  ;;  %730 = vmatpush.msra.mxu3 %v3405_v42  ;;  %v508_v31 = vsub.f32 %v506_v14, %v507_v25  ;;  %v1077_v54 = vsel %vm78_vm5, %v1076_v48, %v1075_v50  ;;  %v1474_v48 = vrot.slane %v1454_v41, 2  ;;  %v1650_v51 = vld [vmem:[#allocation2 + $0x18] sm:$0x1]  ;;  %v1651_v55 = vld [vmem:[#allocation2 + $0x28] sm:$0x1]  ;;  %vm453_vm10 = vcmask 1048064  }
  0x32   :  { %699 = vmatpush.msra.mxu2 %v3372_v3  ;;  %v1079_v61 = vsel %vm81_vm6, %v1078_v53, %v1077_v54  ;;  %v1476_v53 = vrot.slane %v1455_v47, 1  ;;  %v1665_v56 = vrot.slane %v1650_v51, 7  ;;  %v1649_v59 = vld [vmem:[#allocation2 + $0x8] sm:$0x1]  ;;  %v1847_v60 = vld [vmem:[#allocation2 + $0x19] sm:$0x1] }
  0x33   :  { %736 = vmatpush.msra.mxu3 %v3407_v43  ;;  %v509_v46 = vand.u32 4294901760, %v508_v31  ;;  %v1080_v8 = vsel %vm83_vm7, %v1079_v61, 0  ;;  %v1277_v31 = vrot.slane %v1257_v27, 2  ;;  %v1652_v63 = vld [vmem:[#allocation2 + $0x38] sm:$0x1] }
  0x34   :  { %365 = vmatmul.f32.vlgmr.msra.gmra.mxu0 %v3446_v40  ;;  %701 = vmatpush.msra.mxu2 %v3374_v4  ;;  %v880_v40 = vsel %vm78_vm5, %v879_v35, %v878_v37  ;;  %v3535_v19 = vand.u32 4294901760, %v1080_v8  ;;  %v1666_v6 = vsel %vm63_vm0, %v1665_v56, %v1649_v59  ;;  %v1848_v7 = vld [vmem:[#allocation2 + $0x29] sm:$0x1]  ;;  %v1669_v13 = vrot.slane %v1652_v63, 5  ;;  %v1849_v18 = vld [vmem:[#allocation2 + $0x39] sm:$0x1] }
  0x35   :  { %541 = vmatmul.f32.vlgmr.msrb.gmra.mxu1 %v3466_v1  ;;  %613 = vmatpush.msra.mxu0 %v3387_v22  ;;  %v882_v52 = vsel %vm81_vm6, %v881_v44, %v880_v40  ;;  %v1472_v44 = vrot.slane %v1453_v34, 3  ;;  %v1864_v20 = vrot.slane %v1848_v7, 6  ;;  %v1654_v62 = vld [vmem:[#allocation2 + $0x58] sm:$0x1]  ;;  %v1851_v36 = vld [vmem:[#allocation2 + $0x59] sm:$0x1] }
  0x36   :  { %783 = vmatpush.msrb.mxu1 %v3372_v3  ;;  %v883_v58 = vsel %vm83_vm7, %v882_v52, 0  ;;  %v3547_v32 = vsub.f32 %v1080_v8, %v3535_v19  ;;  %v1862_v8 = vrot.slane %v1847_v60, 7  ;;  %v1853_v47 = vld [vmem:[#allocation2 + $0x79] sm:$0x1]  ;;  %v2048_v51 = vld [vmem:[#allocation2 + $0x1a] sm:$0x1] }
  0x37   :  { %617 = vmatpush.msra.mxu0 %v3391_v23  ;;  %v3522_v2 = vand.u32 4294901760, %v883_v58  ;;  %v2063_v56 = vrot.slane %v2048_v51, 7  ;;  %v2047_v59 = vld [vmem:[#allocation2 + $0xa] sm:$0x1]  ;;  %v2245_v60 = vld [vmem:[#allocation2 + $0x1b] sm:$0x1] }
  0x38   :  { %592 = vmatmul.f32.vlgmr.msrb.gmra.mxu3 %v507_v25  ;;  %785 = vmatpush.msrb.mxu1 %v3374_v4  ;;  %v1468_v25 = vrot.slane %v1451_v16, 5  ;;  %v1102_v39 = vand.u32 4294901760, %v3547_v32  ;;  %v2050_v63 = vld [vmem:[#allocation2 + $0x3a] sm:$0x1]  ;;  %v2446_v51 = vld [vmem:[#allocation2 + $0x1c] sm:$0x1] }
  0x39   :  { %567 = vmatmul.f32.vlgmr.msrb.gmra.mxu2 %v506_v14  ;;  %835 = vmatpush.msrb.mxu3 %v3372_v3  ;;  %v1270_v14 = vsel %vm66_vm1, %v1269_v0, %v1268_v5  ;;  %v904_v15 = vsub.f32 %v883_v58, %v3522_v2  ;;  %v1667_v0 = vrot.slane %v1651_v55, 6  ;;  %v2049_v55 = vld [vmem:[#allocation2 + $0x2a] sm:$0x1]  ;;  %v2064_v7 = vsel %vm63_vm0, %v2063_v56, %v2047_v59  ;;  %v2445_v59 = vld [vmem:[#allocation2 + $0xc] sm:$0x1] }
  0x3a   :  { %810 = vmatpush.msrb.mxu2 %v3387_v22  ;;  %v1272_v24 = vsel %vm69_vm2, %v1271_v12, %v1270_v14  ;;  %v1469_v37 = vsel %vm69_vm2, %v1468_v25, %v1467_v30  ;;  %v1103_v49 = vsub.f32 %v3547_v32, %v1102_v39  ;;  %v1653_v12 = vld [vmem:[#allocation2 + $0x48] sm:$0x1]  ;;  %v1846_v14 = vld [vmem:[#allocation2 + $0x9] sm:$0x1]  ;;  %v1673_v30 = vrot.slane %v1654_v62, 3 }
  0x3b   :  { %837 = vmatpush.msrb.mxu3 %v3374_v4  ;;  %v905_v26 = vand.u32 4294901760, %v904_v15  ;;  %v1274_v33 = vsel %vm72_vm3, %v1273_v21, %v1272_v24  ;;  %v1671_v24 = vrot.slane %v1653_v12, 4  ;;  %v2461_v56 = vrot.slane %v2446_v51, 7 }
  0x3c   :  { %510 = vmatmul.f32.vlgmr.msrb.gmra.mxu0 %v509_v46  ;;  %814 = vmatpush.msrb.mxu2 %v3391_v23 }
  0x3d   :  { %642 = vmatmul.f32.vlgmr.msra.gmra.mxu1 %v3466_v1  ;;  %758 = vmatpush.msrb.mxu0 %v3377_v10 }
  0x3e   :  { %931 = vmatpush.msra.mxu1 %v3405_v42 }
  0x3f   :  { %761 = vmatpush.msrb.mxu0 %v3380_v11 }
  0x40   :  { %738 = vmatmul.f32.vlgmr.msra.gmra.mxu3 %v3478_v17  ;;  %937 = vmatpush.msra.mxu1 %v3407_v43 }
  0x41   :  { %707 = vmatmul.f32.vlgmr.msra.gmra.mxu2 %v706_v57  ;;  %984 = vmatpush.msra.mxu3 %v3372_v3  ;;  %v1104_v57 = vand.u32 4294901760, %v1103_v49 }
  0x42   :  { %959 = vmatpush.msra.mxu2 %v3377_v10 }
  0x43   :  { %986 = vmatpush.msra.mxu3 %v3374_v4 }
  0x44   :  { %619 = vmatmul.f32.vlgmr.msra.gmra.mxu0 %v3466_v1  ;;  %962 = vmatpush.msra.mxu2 %v3380_v11  ;;  %v1452_v1 = vld [vmem:[#allocation2 + $0x47] sm:$0x1] }
  0x45   :  { %789 = vmatmul.f32.vlgmr.msrb.gmra.mxu1 %v704_v38  ;;  %900 = vmatpush.msra.mxu0 %v3372_v3  ;;  %v1470_v35 = vrot.slane %v1452_v1, 4  ;;  %v1276_v38 = vsel %vm75_vm4, %v1275_v28, %v1274_v33  ;;  %v1863_v1 = vsel %vm63_vm0, %v1862_v8, %v1846_v14  ;;  %v1655_v28 = vld [vmem:[#allocation2 + $0x68] sm:$0x1]  ;;  %v2246_v8 = vld [vmem:[#allocation2 + $0x2b] sm:$0x1]  ;;  %v2067_v14 = vrot.slane %v2050_v63, 5 }
  0x46   :  { %1036 = vmatpush.msrb.mxu1 %v3372_v3  ;;  %v1865_v33 = vsel %vm66_vm1, %v1864_v20, %v1863_v1  ;;  %v2247_v20 = vld [vmem:[#allocation2 + $0x3b] sm:$0x1]  ;;  %v2262_v62 = vrot.slane %v2246_v8, 6  ;;  %v2052_v1 = vld [vmem:[#allocation2 + $0x5a] sm:$0x1]  ;;  %v2462_v8 = vsel %vm63_vm0, %v2461_v56, %v2445_v59 }
  0x47   :  { %902 = vmatpush.msra.mxu0 %v3374_v4  ;;  %v1471_v40 = vsel %vm72_vm3, %v1470_v35, %v1469_v37  ;;  %v1656_v37 = vld [vmem:[#allocation2 + $0x78] sm:$0x1]  ;;  %v2448_v63 = vld [vmem:[#allocation2 + $0x3c] sm:$0x1]  ;;  %v2845_v56 = vld [vmem:[#allocation2 + $0x2e] sm:$0x1] }
  0x48   :  { %839 = vmatmul.f32.vlgmr.msrb.gmra.mxu3 %v3478_v17  ;;  %1038 = vmatpush.msrb.mxu1 %v3374_v4  ;;  %v1473_v50 = vsel %vm75_vm4, %v1472_v44, %v1471_v40  ;;  %v1852_v44 = vld [vmem:[#allocation2 + $0x69] sm:$0x1]  ;;  %v1677_v40 = vrot.slane %v1656_v37, 1  ;;  %v2249_v37 = vld [vmem:[#allocation2 + $0x5b] sm:$0x1] }
  0x49   :  { %816 = vmatmul.f32.vlgmr.msrb.gmra.mxu2 %v3478_v17  ;;  %1128 = vmatpush.msrb.mxu3 %v3405_v42  ;;  %v906_v17 = vsub.f32 %v904_v15, %v905_v26  ;;  %v1475_v54 = vsel %vm78_vm5, %v1474_v48, %v1473_v50  ;;  %v1872_v48 = vrot.slane %v1852_v44, 2 }
  0x4a   :  { %1097 = vmatpush.msrb.mxu2 %v3372_v3  ;;  %v1477_v61 = vsel %vm81_vm6, %v1476_v53, %v1475_v54  ;;  %v1874_v53 = vrot.slane %v1853_v47, 1  ;;  %v2251_v47 = vld [vmem:[#allocation2 + $0x7b] sm:$0x1] }
  0x4b   :  { %1134 = vmatpush.msrb.mxu3 %v3407_v43  ;;  %v907_v46 = vand.u32 4294901760, %v906_v17  ;;  %v1478_v9 = vsel %vm83_vm7, %v1477_v61, 0  ;;  %v1675_v17 = vrot.slane %v1655_v28, 2 }
  0x4c   :  { %764 = vmatmul.f32.vlgmr.msrb.gmra.mxu0 %v3490_v29  ;;  %1099 = vmatpush.msrb.mxu2 %v3374_v4  ;;  %v1278_v29 = vsel %vm78_vm5, %v1277_v31, %v1276_v38  ;;  %v3592_v21 = vand.u32 4294901760, %v1478_v9 }
  0x4d   :  { %939 = vmatmul.f32.vlgmr.msra.gmra.mxu1 %v3522_v2  ;;  %1011 = vmatpush.msrb.mxu0 %v3387_v22  ;;  %v1280_v52 = vsel %vm81_vm6, %v1279_v45, %v1278_v29  ;;  %v1870_v45 = vrot.slane %v1851_v36, 3 }
  0x4e   :  { %1181 = vmatpush.msra.mxu1 %v3372_v3  ;;  %v1281_v58 = vsel %vm83_vm7, %v1280_v52, 0  ;;  %v3604_v34 = vsub.f32 %v1478_v9, %v3592_v21  ;;  %v2260_v9 = vrot.slane %v2245_v60, 7  ;;  %v2643_v60 = vld [vmem:[#allocation2 + $0x1d] sm:$0x1] }
  0x4f   :  { %1015 = vmatpush.msrb.mxu0 %v3391_v23  ;;  %v3579_v5 = vand.u32 4294901760, %v1281_v58 }
  0x50   :  { %990 = vmatmul.f32.vlgmr.msra.gmra.mxu3 %v905_v26  ;;  %1183 = vmatpush.msra.mxu1 %v3374_v4  ;;  %v1866_v26 = vrot.slane %v1849_v18, 5  ;;  %v1500_v41 = vand.u32 4294901760, %v3604_v34 }
  0x51   :  { %965 = vmatmul.f32.vlgmr.msra.gmra.mxu2 %v904_v15  ;;  %1233 = vmatpush.msra.mxu3 %v3372_v3  ;;  %v1668_v15 = vsel %vm66_vm1, %v1667_v0, %v1666_v6  ;;  %v1302_v16 = vsub.f32 %v1281_v58, %v3579_v5  ;;  %v2065_v0 = vrot.slane %v2049_v55, 6  ;;  %v2447_v55 = vld [vmem:[#allocation2 + $0x2c] sm:$0x1] }
  0x52   :  { %1208 = vmatpush.msra.mxu2 %v3387_v22  ;;  %v1670_v25 = vsel %vm69_vm2, %v1669_v13, %v1668_v15  ;;  %v1867_v38 = vsel %vm69_vm2, %v1866_v26, %v1865_v33  ;;  %v1501_v49 = vsub.f32 %v3604_v34, %v1500_v41  ;;  %v2051_v13 = vld [vmem:[#allocation2 + $0x4a] sm:$0x1]  ;;  %v2244_v15 = vld [vmem:[#allocation2 + $0xb] sm:$0x1]  ;;  %v2071_v33 = vrot.slane %v2052_v1, 3 }
  0x53   :  { %1235 = vmatpush.msra.mxu3 %v3374_v4  ;;  %v1303_v27 = vand.u32 4294901760, %v1302_v16  ;;  %v1672_v35 = vsel %vm72_vm3, %v1671_v24, %v1670_v25  ;;  %v2069_v25 = vrot.slane %v2051_v13, 4 }
  0x54   :  { %908 = vmatmul.f32.vlgmr.msra.gmra.mxu0 %v907_v46  ;;  %1212 = vmatpush.msra.mxu2 %v3391_v23 }
  0x55   :  { %1040 = vmatmul.f32.vlgmr.msrb.gmra.mxu1 %v3522_v2  ;;  %1156 = vmatpush.msra.mxu0 %v3377_v10 }
  0x56   :  { %1329 = vmatpush.msrb.mxu1 %v3405_v42 }
  0x57   :  { %1159 = vmatpush.msra.mxu0 %v3380_v11 }
  0x58   :  { %1136 = vmatmul.f32.vlgmr.msrb.gmra.mxu3 %v3535_v19  ;;  %1335 = vmatpush.msrb.mxu1 %v3407_v43 }
  0x59   :  { %1105 = vmatmul.f32.vlgmr.msrb.gmra.mxu2 %v1104_v57  ;;  %1382 = vmatpush.msrb.mxu3 %v3372_v3  ;;  %v1502_v57 = vand.u32 4294901760, %v1501_v49 }
  0x5a   :  { %1357 = vmatpush.msrb.mxu2 %v3377_v10 }
  0x5b   :  { %1384 = vmatpush.msrb.mxu3 %v3374_v4 }
  0x5c   :  { %1017 = vmatmul.f32.vlgmr.msrb.gmra.mxu0 %v3522_v2  ;;  %1360 = vmatpush.msrb.mxu2 %v3380_v11  ;;  %v1850_v2 = vld [vmem:[#allocation2 + $0x49] sm:$0x1] }
  0x5d   :  { %1187 = vmatmul.f32.vlgmr.msra.gmra.mxu1 %v1102_v39  ;;  %1298 = vmatpush.msrb.mxu0 %v3372_v3  ;;  %v1868_v31 = vrot.slane %v1850_v2, 4  ;;  %v1674_v39 = vsel %vm75_vm4, %v1673_v30, %v1672_v35  ;;  %v2261_v2 = vsel %vm63_vm0, %v2260_v9, %v2244_v15  ;;  %v2053_v30 = vld [vmem:[#allocation2 + $0x6a] sm:$0x1]  ;;  %v2644_v9 = vld [vmem:[#allocation2 + $0x2d] sm:$0x1]  ;;  %v2465_v15 = vrot.slane %v2448_v63, 5 }
  0x5e   :  { %1434 = vmatpush.msra.mxu1 %v3372_v3  ;;  %v2263_v35 = vsel %vm66_vm1, %v2262_v62, %v2261_v2  ;;  %v2645_v62 = vld [vmem:[#allocation2 + $0x3d] sm:$0x1]  ;;  %v2660_v1 = vrot.slane %v2644_v9, 6  ;;  %v2450_v2 = vld [vmem:[#allocation2 + $0x5c] sm:$0x1] }
  0x5f   :  { %1300 = vmatpush.msrb.mxu0 %v3374_v4  ;;  %v1869_v29 = vsel %vm72_vm3, %v1868_v31, %v1867_v38  ;;  %v2054_v38 = vld [vmem:[#allocation2 + $0x7a] sm:$0x1] }
  0x60   :  { %1237 = vmatmul.f32.vlgmr.msra.gmra.mxu3 %v3535_v19  ;;  %1436 = vmatpush.msra.mxu1 %v3374_v4  ;;  %v1871_v50 = vsel %vm75_vm4, %v1870_v45, %v1869_v29  ;;  %v2250_v45 = vld [vmem:[#allocation2 + $0x6b] sm:$0x1]  ;;  %v2075_v29 = vrot.slane %v2054_v38, 1  ;;  %v2647_v38 = vld [vmem:[#allocation2 + $0x5d] sm:$0x1] }
  0x61   :  { %1214 = vmatmul.f32.vlgmr.msra.gmra.mxu2 %v3535_v19  ;;  %1526 = vmatpush.msra.mxu3 %v3405_v42  ;;  %v1304_v19 = vsub.f32 %v1302_v16, %v1303_v27  ;;  %v1873_v54 = vsel %vm78_vm5, %v1872_v48, %v1871_v50  ;;  %v2270_v48 = vrot.slane %v2250_v45, 2 }
  0x62   :  { %1495 = vmatpush.msra.mxu2 %v3372_v3  ;;  %v1875_v61 = vsel %vm81_vm6, %v1874_v53, %v1873_v54  ;;  %v2272_v53 = vrot.slane %v2251_v47, 1  ;;  %v2649_v47 = vld [vmem:[#allocation2 + $0x7d] sm:$0x1] }
  0x63   :  { %1532 = vmatpush.msra.mxu3 %v3407_v43  ;;  %v1305_v46 = vand.u32 4294901760, %v1304_v19  ;;  %v1876_v12 = vsel %vm83_vm7, %v1875_v61, 0  ;;  %v2073_v19 = vrot.slane %v2053_v30, 2 }
  0x64   :  { %1162 = vmatmul.f32.vlgmr.msra.gmra.mxu0 %v3547_v32  ;;  %1497 = vmatpush.msra.mxu2 %v3374_v4  ;;  %v1676_v32 = vsel %vm78_vm5, %v1675_v17, %v1674_v39  ;;  %v3649_v24 = vand.u32 4294901760, %v1876_v12 }
  0x65   :  { %1337 = vmatmul.f32.vlgmr.msrb.gmra.mxu1 %v3579_v5  ;;  %1409 = vmatpush.msra.mxu0 %v3387_v22  ;;  %v1678_v52 = vsel %vm81_vm6, %v1677_v40, %v1676_v32  ;;  %v2268_v40 = vrot.slane %v2249_v37, 3 }
  0x66   :  { %1579 = vmatpush.msrb.mxu1 %v3372_v3  ;;  %v1679_v58 = vsel %vm83_vm7, %v1678_v52, 0  ;;  %v3661_v36 = vsub.f32 %v1876_v12, %v3649_v24  ;;  %v2658_v12 = vrot.slane %v2643_v60, 7  ;;  %v2843_v60 = vld [vmem:[#allocation2 + $0xe] sm:$0x1] }
  0x67   :  { %1413 = vmatpush.msra.mxu0 %v3391_v23  ;;  %v3636_v6 = vand.u32 4294901760, %v1679_v58 }
  0x68   :  { %1388 = vmatmul.f32.vlgmr.msrb.gmra.mxu3 %v1303_v27  ;;  %1581 = vmatpush.msrb.mxu1 %v3374_v4  ;;  %v2264_v27 = vrot.slane %v2247_v20, 5  ;;  %v1898_v44 = vand.u32 4294901760, %v3661_v36 }
  0x69   :  { %1363 = vmatmul.f32.vlgmr.msrb.gmra.mxu2 %v1302_v16  ;;  %1631 = vmatpush.msrb.mxu3 %v3372_v3  ;;  %v2066_v16 = vsel %vm66_vm1, %v2065_v0, %v2064_v7  ;;  %v1700_v18 = vsub.f32 %v1679_v58, %v3636_v6  ;;  %v2463_v0 = vrot.slane %v2447_v55, 6 }
  0x6a   :  { %1606 = vmatpush.msrb.mxu2 %v3387_v22  ;;  %v2068_v26 = vsel %vm69_vm2, %v2067_v14, %v2066_v16  ;;  %v2265_v39 = vsel %vm69_vm2, %v2264_v27, %v2263_v35  ;;  %v1899_v49 = vsub.f32 %v3661_v36, %v1898_v44  ;;  %v2449_v14 = vld [vmem:[#allocation2 + $0x4c] sm:$0x1]  ;;  %v2642_v16 = vld [vmem:[#allocation2 + $0xd] sm:$0x1]  ;;  %v2469_v35 = vrot.slane %v2450_v2, 3 }
  0x6b   :  { %1633 = vmatpush.msrb.mxu3 %v3374_v4  ;;  %v1701_v28 = vand.u32 4294901760, %v1700_v18  ;;  %v2070_v31 = vsel %vm72_vm3, %v2069_v25, %v2068_v26  ;;  %v2467_v26 = vrot.slane %v2449_v14, 4 }
  0x6c   :  { %1306 = vmatmul.f32.vlgmr.msrb.gmra.mxu0 %v1305_v46  ;;  %1610 = vmatpush.msrb.mxu2 %v3391_v23 }
  0x6d   :  { %1438 = vmatmul.f32.vlgmr.msra.gmra.mxu1 %v3579_v5  ;;  %1554 = vmatpush.msrb.mxu0 %v3377_v10 }
  0x6e   :  { %1727 = vmatpush.msra.mxu1 %v3405_v42 }
  0x6f   :  { %1557 = vmatpush.msrb.mxu0 %v3380_v11 }
  0x70   :  { %1534 = vmatmul.f32.vlgmr.msra.gmra.mxu3 %v3592_v21  ;;  %1733 = vmatpush.msra.mxu1 %v3407_v43 }
  0x71   :  { %1503 = vmatmul.f32.vlgmr.msra.gmra.mxu2 %v1502_v57  ;;  %1780 = vmatpush.msra.mxu3 %v3372_v3  ;;  %v1900_v57 = vand.u32 4294901760, %v1899_v49 }
  0x72   :  { %1755 = vmatpush.msra.mxu2 %v3377_v10 }
  0x73   :  { %1782 = vmatpush.msra.mxu3 %v3374_v4 }
  0x74   :  { %1415 = vmatmul.f32.vlgmr.msra.gmra.mxu0 %v3579_v5  ;;  %1758 = vmatpush.msra.mxu2 %v3380_v11  ;;  %v2248_v5 = vld [vmem:[#allocation2 + $0x4b] sm:$0x1] }
  0x75   :  { %1585 = vmatmul.f32.vlgmr.msrb.gmra.mxu1 %v1500_v41  ;;  %1696 = vmatpush.msra.mxu0 %v3372_v3  ;;  %v2266_v17 = vrot.slane %v2248_v5, 4  ;;  %v2072_v41 = vsel %vm75_vm4, %v2071_v33, %v2070_v31  ;;  %v2659_v5 = vsel %vm63_vm0, %v2658_v12, %v2642_v16  ;;  %v2451_v33 = vld [vmem:[#allocation2 + $0x6c] sm:$0x1] }
  0x76   :  { %1832 = vmatpush.msrb.mxu1 %v3372_v3  ;;  %v2661_v31 = vsel %vm66_vm1, %v2660_v1, %v2659_v5  ;;  %v2847_v1 = vld [vmem:[#allocation2 + $0x4e] sm:$0x1] }
  0x77   :  { %1698 = vmatpush.msra.mxu0 %v3374_v4  ;;  %v2267_v32 = vsel %vm72_vm3, %v2266_v17, %v2265_v39  ;;  %v2452_v39 = vld [vmem:[#allocation2 + $0x7c] sm:$0x1] }
  0x78   :  { %1635 = vmatmul.f32.vlgmr.msrb.gmra.mxu3 %v3592_v21  ;;  %1834 = vmatpush.msrb.mxu1 %v3374_v4  ;;  %v2269_v50 = vsel %vm75_vm4, %v2268_v40, %v2267_v32  ;;  %v2648_v40 = vld [vmem:[#allocation2 + $0x6d] sm:$0x1]  ;;  %v2473_v32 = vrot.slane %v2452_v39, 1 }
  0x79   :  { %1612 = vmatmul.f32.vlgmr.msrb.gmra.mxu2 %v3592_v21  ;;  %1924 = vmatpush.msrb.mxu3 %v3405_v42  ;;  %v1702_v21 = vsub.f32 %v1700_v18, %v1701_v28  ;;  %v2271_v54 = vsel %vm78_vm5, %v2270_v48, %v2269_v50  ;;  %v2668_v48 = vrot.slane %v2648_v40, 2 }
  0x7a   :  { %1893 = vmatpush.msrb.mxu2 %v3372_v3  ;;  %v2273_v61 = vsel %vm81_vm6, %v2272_v53, %v2271_v54  ;;  %v2670_v54 = vrot.slane %v2649_v47, 1 }
  0x7b   :  { %1930 = vmatpush.msrb.mxu3 %v3407_v43  ;;  %v1703_v46 = vand.u32 4294901760, %v1702_v21  ;;  %v2274_v13 = vsel %vm83_vm7, %v2273_v61, 0  ;;  %v2471_v21 = vrot.slane %v2451_v33, 2  ;;  %v3041_v61 = vld [vmem:[#allocation2 + $0x1f] sm:$0x1] }
  0x7c   :  { %1560 = vmatmul.f32.vlgmr.msrb.gmra.mxu0 %v3604_v34  ;;  %1895 = vmatpush.msrb.mxu2 %v3374_v4  ;;  %v2074_v34 = vsel %vm78_vm5, %v2073_v19, %v2072_v41  ;;  %v3706_v25 = vand.u32 4294901760, %v2274_v13  ;;  %v3056_v16 = vrot.slane %v3041_v61, 7 }
  0x7d   :  { %1735 = vmatmul.f32.vlgmr.msra.gmra.mxu1 %v3636_v6  ;;  %1807 = vmatpush.msrb.mxu0 %v3387_v22  ;;  %v2076_v52 = vsel %vm81_vm6, %v2075_v29, %v2074_v34  ;;  %v2666_v29 = vrot.slane %v2647_v38, 3 }
  0x7e   :  { %1977 = vmatpush.msra.mxu1 %v3372_v3  ;;  %v2077_v58 = vsel %vm83_vm7, %v2076_v52, 0  ;;  %v3718_v37 = vsub.f32 %v2274_v13, %v3706_v25  ;;  %v2844_v52 = vld [vmem:[#allocation2 + $0x1e] sm:$0x1] }
  0x7f   :  { %1811 = vmatpush.msrb.mxu0 %v3391_v23  ;;  %v3693_v7 = vand.u32 4294901760, %v2077_v58 }
  0x80   :  { %1786 = vmatmul.f32.vlgmr.msra.gmra.mxu3 %v1701_v28  ;;  %1979 = vmatpush.msra.mxu1 %v3374_v4  ;;  %v2662_v28 = vrot.slane %v2645_v62, 5  ;;  %v2296_v45 = vand.u32 4294901760, %v3718_v37 }
  0x81   :  { %1761 = vmatmul.f32.vlgmr.msra.gmra.mxu2 %v1700_v18  ;;  %2029 = vmatpush.msra.mxu3 %v3372_v3  ;;  %v2464_v18 = vsel %vm66_vm1, %v2463_v0, %v2462_v8  ;;  %v2098_v20 = vsub.f32 %v2077_v58, %v3693_v7  ;;  %v2846_v0 = vld [vmem:[#allocation2 + $0x3e] sm:$0x1]  ;;  %v2861_v8 = vrot.slane %v2845_v56, 6  ;;  %v3046_v56 = vld [vmem:[#allocation2 + $0x6f] sm:$0x1] }
  0x82   :  { %2004 = vmatpush.msra.mxu2 %v3387_v22  ;;  %v2466_v27 = vsel %vm69_vm2, %v2465_v15, %v2464_v18  ;;  %v2663_v41 = vsel %vm69_vm2, %v2662_v28, %v2661_v31  ;;  %v2297_v49 = vsub.f32 %v3718_v37, %v2296_v45  ;;  %v3042_v15 = vld [vmem:[#allocation2 + $0x2f] sm:$0x1]  ;;  %v2863_v2 = vrot.slane %v2846_v0, 5  ;;  %v2848_v31 = vld [vmem:[#allocation2 + $0x5e] sm:$0x1] }
  0x83   :  { %2031 = vmatpush.msra.mxu3 %v3374_v4  ;;  %v2099_v30 = vand.u32 4294901760, %v2098_v20  ;;  %v2468_v17 = vsel %vm72_vm3, %v2467_v26, %v2466_v27  ;;  %v3040_v26 = vld [vmem:[#allocation2 + $0xf] sm:$0x1]  ;;  %v3058_v33 = vrot.slane %v3042_v15, 6  ;;  %v3066_v0 = vrot.slane %v3046_v56, 2 }
  0x84   :  { %1704 = vmatmul.f32.vlgmr.msra.gmra.mxu0 %v1703_v46  ;;  %2008 = vmatpush.msra.mxu2 %v3391_v23  ;;  %v2298_v58 = vand.u32 4294901760, %v2297_v49  ;;  %v3057_v38 = vsel %vm63_vm0, %v3056_v16, %v3040_v26  ;;  %v2850_v49 = vld [vmem:[#allocation2 + $0x7e] sm:$0x1] }
  0x85   :  { %1836 = vmatmul.f32.vlgmr.msrb.gmra.mxu1 %v3636_v6  ;;  %1952 = vmatpush.msra.mxu0 %v3377_v10 }
  0x86   :  { %2125 = vmatpush.msrb.mxu1 %v3405_v42 }
  0x87   :  { %1955 = vmatpush.msra.mxu0 %v3380_v11 }
  0x88   :  { %1932 = vmatmul.f32.vlgmr.msrb.gmra.mxu3 %v3649_v24  ;;  %2131 = vmatpush.msrb.mxu1 %v3407_v43 }
  0x89   :  { %1901 = vmatmul.f32.vlgmr.msrb.gmra.mxu2 %v1900_v57  ;;  %2178 = vmatpush.msrb.mxu3 %v3372_v3  ;;  %v2859_v57 = vrot.slane %v2844_v52, 7 }
  0x8a   :  { %2153 = vmatpush.msrb.mxu2 %v3377_v10 }
  0x8b   :  { %2180 = vmatpush.msrb.mxu3 %v3374_v4  ;;  %v2860_v12 = vsel %vm63_vm0, %v2859_v57, %v2843_v60 }
  0x8c   :  { %1813 = vmatmul.f32.vlgmr.msrb.gmra.mxu0 %v3636_v6  ;;  %2156 = vmatpush.msrb.mxu2 %v3380_v11  ;;  %v2646_v6 = vld [vmem:[#allocation2 + $0x4d] sm:$0x1]  ;;  %v2862_v27 = vsel %vm66_vm1, %v2861_v8, %v2860_v12 }
  0x8d   :  { %1983 = vmatmul.f32.vlgmr.msra.gmra.mxu1 %v1898_v44  ;;  %2094 = vmatpush.msrb.mxu0 %v3372_v3  ;;  %v2664_v19 = vrot.slane %v2646_v6, 4  ;;  %v2470_v44 = vsel %vm75_vm4, %v2469_v35, %v2468_v17  ;;  %v2865_v17 = vrot.slane %v2847_v1, 4 }
  0x8e   :  { %2230 = vmatpush.msra.mxu1 %v3372_v3 }
  0x8f   :  { %2096 = vmatpush.msrb.mxu0 %v3374_v4  ;;  %v2665_v34 = vsel %vm72_vm3, %v2664_v19, %v2663_v41  ;;  %v2864_v19 = vsel %vm69_vm2, %v2863_v2, %v2862_v27 }
  0x90   :  { %2033 = vmatmul.f32.vlgmr.msra.gmra.mxu3 %v3649_v24  ;;  %2232 = vmatpush.msra.mxu1 %v3374_v4  ;;  %v2667_v51 = vsel %vm75_vm4, %v2666_v29, %v2665_v34 }
  0x91   :  { %2010 = vmatmul.f32.vlgmr.msra.gmra.mxu2 %v3649_v24  ;;  %2322 = vmatpush.msra.mxu3 %v3405_v42  ;;  %v2100_v24 = vsub.f32 %v2098_v20, %v2099_v30  ;;  %v2669_v55 = vsel %vm78_vm5, %v2668_v48, %v2667_v51 }
  0x92   :  { %2291 = vmatpush.msra.mxu2 %v3372_v3  ;;  %v2671_v63 = vsel %vm81_vm6, %v2670_v54, %v2669_v55 }
  0x93   :  { %2328 = vmatpush.msra.mxu3 %v3407_v43  ;;  %v2101_v46 = vand.u32 4294901760, %v2100_v24  ;;  %v2672_v62 = vsel %vm83_vm7, %v2671_v63, 0  ;;  %v2849_v24 = vld [vmem:[#allocation2 + $0x6e] sm:$0x1]  ;;  %v3047_v63 = vld [vmem:[#allocation2 + $0x7f] sm:$0x1] }
  0x94   :  { %1958 = vmatmul.f32.vlgmr.msra.gmra.mxu0 %v3661_v36  ;;  %2293 = vmatpush.msra.mxu2 %v3374_v4  ;;  %v2472_v36 = vsel %vm78_vm5, %v2471_v21, %v2470_v44  ;;  %v3763_v35 = vand.u32 4294901760, %v2672_v62  ;;  %v2867_v44 = vrot.slane %v2848_v31, 3 }
  0x95   :  { %2133 = vmatmul.f32.vlgmr.msrb.gmra.mxu1 %v3693_v7  ;;  %2205 = vmatpush.msra.mxu0 %v3387_v22  ;;  %v2474_v53 = vsel %vm81_vm6, %v2473_v32, %v2472_v36  ;;  %v2866_v32 = vsel %vm72_vm3, %v2865_v17, %v2864_v19 }
  0x96   :  { %2375 = vmatpush.msrb.mxu1 %v3372_v3  ;;  %v2475_v59 = vsel %vm83_vm7, %v2474_v53, 0  ;;  %v3775_v29 = vsub.f32 %v2672_v62, %v3763_v35  ;;  %v2868_v54 = vsel %vm75_vm4, %v2867_v44, %v2866_v32 }
  0x97   :  { %2209 = vmatpush.msra.mxu0 %v3391_v23  ;;  %v3750_v9 = vand.u32 4294901760, %v2475_v59 }
  0x98   :  { %2184 = vmatmul.f32.vlgmr.msrb.gmra.mxu3 %v2099_v30  ;;  %2377 = vmatpush.msrb.mxu1 %v3374_v4  ;;  %v3043_v30 = vld [vmem:[#allocation2 + $0x3f] sm:$0x1]  ;;  %v2694_v55 = vand.u32 4294901760, %v3775_v29 }
  0x99   :  { %2159 = vmatmul.f32.vlgmr.msrb.gmra.mxu2 %v2098_v20  ;;  %2427 = vmatpush.msrb.mxu3 %v3372_v3  ;;  %v2496_v28 = vsub.f32 %v2475_v59, %v3750_v9  ;;  %v3060_v39 = vrot.slane %v3043_v30, 5 }
  0x9a   :  { %v141_v50 = vpop.f32.mrf.mxu1  ;;  %2402 = vmatpush.msrb.mxu2 %v3387_v22  ;;  %v2695_v12 = vsub.f32 %v3775_v29, %v2694_v55 }
  0x9b   :  { %2429 = vmatpush.msrb.mxu3 %v3374_v4  ;;  %v2497_v41 = vand.u32 4294901760, %v2496_v28 }
  0x9c   :  { %2102 = vmatmul.f32.vlgmr.msrb.gmra.mxu0 %v2101_v46  ;;  %2406 = vmatpush.msrb.mxu2 %v3391_v23  ;;  %v3045_v46 = vld [vmem:[#allocation2 + $0x5f] sm:$0x1]  ;;  %v2696_v26 = vand.u32 4294901760, %v2695_v12 }
  0x9d   :  { %2234 = vmatmul.f32.vlgmr.msra.gmra.mxu1 %v3693_v7  ;;  %2350 = vmatpush.msrb.mxu0 %v3377_v10  ;;  %v2498_v53 = vsub.f32 %v2496_v28, %v2497_v41  ;;  %v3064_v57 = vrot.slane %v3045_v46, 3 }
  0x9e   :  { %2523 = vmatpush.msra.mxu1 %v3405_v42 }
  0x9f   :  { %2353 = vmatpush.msrb.mxu0 %v3380_v11  ;;  %v2499_v61 = vand.u32 4294901760, %v2498_v53 }
  0xa0   :  { %2330 = vmatmul.f32.vlgmr.msra.gmra.mxu3 %v3706_v25  ;;  %2529 = vmatpush.msra.mxu1 %v3407_v43 }
  0xa1   :  { %2299 = vmatmul.f32.vlgmr.msra.gmra.mxu2 %v2298_v58  ;;  %v110_v13 = vpop.f32.mrf.mxu0  ;;  %v167_v14 = vpop.f32.mrf.mxu2  ;;  %2576 = vmatpush.msra.mxu3 %v3372_v3 }
  0xa2   :  { %v142_v18 = vadd.f32 %v141_v50, %v110_v13  ;;  %v242_v20 = vpop.f32.mrf.mxu1  ;;  %2551 = vmatpush.msra.mxu2 %v3377_v10  ;;  %v2869_v50 = vrot.slane %v2849_v24, 2 }
  0xa3   :  { %v192_v5 = vpop.f32.mrf.mxu3  ;;  %2578 = vmatpush.msra.mxu3 %v3374_v4 }
  0xa4   :  { %v168_v6 = vadd.f32 %v167_v14, %v142_v18  ;;  %2211 = vmatmul.f32.vlgmr.msra.gmra.mxu0 %v3693_v7  ;;  %2554 = vmatpush.msra.mxu2 %v3380_v11  ;;  %v3044_v7 = vld [vmem:[#allocation2 + $0x4f] sm:$0x1]  ;;  %v2870_v59 = vsel %vm78_vm5, %v2869_v50, %v2868_v54 }
  0xa5   :  { %2381 = vmatmul.f32.vlgmr.msrb.gmra.mxu1 %v2296_v45  ;;  %2492 = vmatpush.msra.mxu0 %v3372_v3  ;;  %v3059_v45 = vsel %vm66_vm1, %v3058_v33, %v3057_v38  ;;  %v3062_v47 = vrot.slane %v3044_v7, 4 }
  0xa6   :  { %2628 = vmatpush.msrb.mxu1 %v3372_v3  ;;  %v193_v21 = vadd.f32 %v192_v5, %v168_v6 }
  0xa7   :  { %2494 = vmatpush.msra.mxu0 %v3374_v4 }
  0xa8   :  { %2431 = vmatmul.f32.vlgmr.msrb.gmra.mxu3 %v3706_v25  ;;  %2630 = vmatpush.msrb.mxu1 %v3374_v4 }
  0xa9   :  { %2408 = vmatmul.f32.vlgmr.msrb.gmra.mxu2 %v3706_v25  ;;  %v219_v40 = vpop.f32.mrf.mxu0  ;;  %2720 = vmatpush.msrb.mxu3 %v3405_v42  ;;  %v3061_v25 = vsel %vm69_vm2, %v3060_v39, %v3059_v45 }
  0xaa   :  { %v220_v34 = vadd.f32 %v219_v40, %v193_v21  ;;  %v391_v36 = vpop.f32.mrf.mxu1  ;;  %2689 = vmatpush.msrb.mxu2 %v3372_v3  ;;  %v3063_v58 = vsel %vm72_vm3, %v3062_v47, %v3061_v25 }
  0xab   :  { %v340_v48 = vpop.f32.mrf.mxu3  ;;  %2726 = vmatpush.msrb.mxu3 %v3407_v43  ;;  %v3065_v13 = vsel %vm75_vm4, %v3064_v57, %v3063_v58 }
  0xac   :  { %v3781_v51 = vadd.f32 %v242_v20, %v220_v34  ;;  %v309_v52 = vpop.f32.mrf.mxu2  ;;  %2356 = vmatmul.f32.vlgmr.msrb.gmra.mxu0 %v3718_v37  ;;  %2691 = vmatpush.msrb.mxu2 %v3374_v4  ;;  %v2871_v37 = vrot.slane %v2850_v49, 1  ;;  %v3068_v20 = vrot.slane %v3047_v63, 1  ;;  %v3067_v2 = vsel %vm78_vm5, %v3066_v0, %v3065_v13 }
  0xad   :  { %2531 = vmatmul.f32.vlgmr.msra.gmra.mxu1 %v3750_v9  ;;  %2603 = vmatpush.msrb.mxu0 %v3387_v22  ;;  %v341_v60 = vadd.f32 %v340_v48, %v309_v52 }
  0xae   :  { %246 = vrot.lane.b32.xlu2 %v3781_v51, %s3348_s0  ;;  %2773 = vmatpush.msra.mxu1 %v3372_v3  ;;  %v2872_v16 = vsel %vm81_vm6, %v2871_v37, %v2870_v59  ;;  %v3069_v6 = vsel %vm81_vm6, %v3068_v20, %v3067_v2 }
  0xaf   :  { %2607 = vmatpush.msrb.mxu0 %v3391_v23  ;;  %v2873_v5 = vsel %vm83_vm7, %v2872_v16, 0  ;;  %v3070_v38 = vsel %vm83_vm7, %v3069_v6, 0 }
  0xb0   :  { %2582 = vmatmul.f32.vlgmr.msra.gmra.mxu3 %v2497_v41  ;;  %2775 = vmatpush.msra.mxu1 %v3374_v4  ;;  %v3813_v30 = vand.u32 4294901760, %v2873_v5  ;;  %v3090_v41 = vand.u32 4294901760, %v3070_v38 }
  0xb1   :  { %2557 = vmatmul.f32.vlgmr.msra.gmra.mxu2 %v2496_v28  ;;  %v366_v8 = vpop.f32.mrf.mxu0  ;;  %2825 = vmatpush.msra.mxu3 %v3372_v3 }
  0xb2   :  { %v367_v14 = vadd.f32 %v366_v8, %v341_v60  ;;  %v542_v15 = vpop.f32.mrf.mxu1  ;;  %2800 = vmatpush.msra.mxu2 %v3387_v22  ;;  %v2894_v39 = vsub.f32 %v2873_v5, %v3813_v30  ;;  %v3091_v45 = vsub.f32 %v3070_v38, %v3090_v41 }
  0xb3   :  { %v441_v18 = vpop.f32.mrf.mxu3  ;;  %2827 = vmatpush.msra.mxu3 %v3374_v4 }
  0xb4   :  { %v392_v62 = vadd.f32 %v391_v36, %v367_v14  ;;  %v418_v1 = vpop.f32.mrf.mxu2  ;;  %2500 = vmatmul.f32.vlgmr.msra.gmra.mxu0 %v2499_v61  ;;  %2804 = vmatpush.msra.mxu2 %v3391_v23  ;;  %v2895_v44 = vand.u32 4294901760, %v2894_v39 }
  0xb5   :  { %2632 = vmatmul.f32.vlgmr.msrb.gmra.mxu1 %v3750_v9  ;;  %2748 = vmatpush.msra.mxu0 %v3377_v10 }
  0xb6   :  { %v419_v27 = vadd.f32 %v418_v1, %v392_v62  ;;  %2921 = vmatpush.msrb.mxu1 %v3405_v42  ;;  %v2896_v47 = vsub.f32 %v2894_v39, %v2895_v44 }
  0xb7   :  { %2751 = vmatpush.msra.mxu0 %v3380_v11 }
  0xb8   :  { %v3810_v28 = vadd.f32 %v441_v18, %v419_v27  ;;  %2728 = vmatmul.f32.vlgmr.msrb.gmra.mxu3 %v3763_v35  ;;  %2927 = vmatpush.msrb.mxu1 %v3407_v43 }
  0xb9   :  { %2697 = vmatmul.f32.vlgmr.msrb.gmra.mxu2 %v2696_v26  ;;  %v511_v33 = vpop.f32.mrf.mxu0  ;;  %2974 = vmatpush.msrb.mxu3 %v3372_v3 }
  0xba   :  { %v543_v31 = vadd.f32 %v542_v15, %v511_v33  ;;  %445 = vrot.lane.b32.xlu0 %v3810_v28, %s3348_s0  ;;  %v643_v17 = vpop.f32.mrf.mxu1  ;;  %2949 = vmatpush.msrb.mxu2 %v3377_v10 }
  0xbb   :  { %v593_v19 = vpop.f32.mrf.mxu3  ;;  %2976 = vmatpush.msrb.mxu3 %v3374_v4 }
  0xbc   :  { %v568_v7 = vpop.f32.mrf.mxu2  ;;  %2609 = vmatmul.f32.vlgmr.msrb.gmra.mxu0 %v3750_v9  ;;  %2952 = vmatpush.msrb.mxu2 %v3380_v11 }
  0xbd   :  { %2779 = vmatmul.f32.vlgmr.msra.gmra.mxu1 %v2694_v55  ;;  %v569_v21 = vadd.f32 %v568_v7, %v543_v31  ;;  %2890 = vmatpush.msrb.mxu0 %v3372_v3 }
  0xbe   :  { %3026 = vmatpush.msra.mxu1 %v3372_v3 }
  0xbf   :  { %v594_v24 = vadd.f32 %v593_v19, %v569_v21  ;;  %2892 = vmatpush.msrb.mxu0 %v3374_v4 }
  0xc0   :  { %2829 = vmatmul.f32.vlgmr.msra.gmra.mxu3 %v3763_v35  ;;  %3028 = vmatpush.msra.mxu1 %v3374_v4 }
  0xc1   :  { %2806 = vmatmul.f32.vlgmr.msra.gmra.mxu2 %v3763_v35  ;;  %v620_v9 = vpop.f32.mrf.mxu0  ;;  %3118 = vmatpush.msra.mxu3 %v3405_v42  ;;  %v3092_v42 = vand.u32 4294901760, %v3091_v45 }
  0xc2   :  { %v621_v40 = vadd.f32 %v620_v9, %v594_v24  ;;  %v790_v32 = vpop.f32.mrf.mxu1  ;;  %3087 = vmatpush.msra.mxu2 %v3372_v3 }
  0xc3   :  { %v739_v34 = vpop.f32.mrf.mxu3  ;;  %3124 = vmatpush.msra.mxu3 %v3407_v43  ;;  %v2897_v43 = vand.u32 4294901760, %v2896_v47 }
  0xc4   :  { %v3834_v36 = vadd.f32 %v643_v17, %v621_v40  ;;  %v708_v46 = vpop.f32.mrf.mxu2  ;;  %2754 = vmatmul.f32.vlgmr.msra.gmra.mxu0 %v3775_v29  ;;  %3089 = vmatpush.msra.mxu2 %v3374_v4  ;;  %v3093_v29 = vsub.f32 %v3091_v45, %v3092_v42 }
  0xc5   :  { %2929 = vmatmul.f32.vlgmr.msrb.gmra.mxu1 %v3813_v30  ;;  %3001 = vmatpush.msra.mxu0 %v3387_v22  ;;  %v740_v35 = vadd.f32 %v739_v34, %v708_v46 }
  0xc6   :  { %3171 = vmatpush.msrb.mxu1 %v3372_v3  ;;  %v3094_v54 = vand.u32 4294901760, %v3093_v29 }
  0xc7   :  { %3005 = vmatpush.msra.mxu0 %v3391_v23 }
  0xc8   :  { %2980 = vmatmul.f32.vlgmr.msrb.gmra.mxu3 %v2895_v44  ;;  %3173 = vmatpush.msrb.mxu1 %v3374_v4 }
  0xc9   :  { %2955 = vmatmul.f32.vlgmr.msrb.gmra.mxu2 %v2894_v39  ;;  %v765_v48 = vpop.f32.mrf.mxu0  ;;  %3223 = vmatpush.msrb.mxu3 %v3372_v3 }
  0xca   :  { %v766_v49 = vadd.f32 %v765_v48, %v740_v35  ;;  %v940_v50 = vpop.f32.mrf.mxu1  ;;  %3198 = vmatpush.msrb.mxu2 %v3387_v22 }
  0xcb   :  { %v840_v25 = vpop.f32.mrf.mxu3  ;;  %3225 = vmatpush.msrb.mxu3 %v3374_v4 }
  0xcc   :  { %v791_v52 = vadd.f32 %v790_v32, %v766_v49  ;;  %v817_v53 = vpop.f32.mrf.mxu2  ;;  %2898 = vmatmul.f32.vlgmr.msrb.gmra.mxu0 %v2897_v43  ;;  %3202 = vmatpush.msrb.mxu2 %v3391_v23 }
  0xcd   :  { %3030 = vmatmul.f32.vlgmr.msra.gmra.mxu1 %v3813_v30  ;;  %3146 = vmatpush.msrb.mxu0 %v3377_v10 }
  0xce   :  { %v818_v55 = vadd.f32 %v817_v53, %v791_v52 }
  0xcf   :  { %3149 = vmatpush.msrb.mxu0 %v3380_v11 }
  0xd0   :  { %v3850_v3 = vadd.f32 %v840_v25, %v818_v55  ;;  %3126 = vmatmul.f32.vlgmr.msra.gmra.mxu3 %v3090_v41 }
  0xd1   :  { %v909_v22 = vpop.f32.mrf.mxu0  ;;  %3095 = vmatmul.f32.vlgmr.msra.gmra.mxu2 %v3094_v54 }
  0xd2   :  { %v941_v56 = vadd.f32 %v940_v50, %v909_v22  ;;  %844 = vrot.lane.b32.xlu0 %v3850_v3, %s3348_s0  ;;  %v1041_v4 = vpop.f32.mrf.mxu1 }
  0xd3   :  { %v991_v57 = vpop.f32.mrf.mxu3 }
  0xd4   :  { %v966_v37 = vpop.f32.mrf.mxu2  ;;  %3007 = vmatmul.f32.vlgmr.msra.gmra.mxu0 %v3813_v30 }
  0xd5   :  { %3177 = vmatmul.f32.vlgmr.msrb.gmra.mxu1 %v3092_v42  ;;  %v967_v10 = vadd.f32 %v966_v37, %v941_v56 }
  0xd7   :  { %v992_v23 = vadd.f32 %v991_v57, %v967_v10 }
  0xd8   :  { %3227 = vmatmul.f32.vlgmr.msrb.gmra.mxu3 %v3090_v41 }
  0xd9   :  { %v1018_v58 = vpop.f32.mrf.mxu0  ;;  %3204 = vmatmul.f32.vlgmr.msrb.gmra.mxu2 %v3090_v41 }
  0xda   :  { %v1019_v11 = vadd.f32 %v1018_v58, %v992_v23  ;;  %v1188_v59 = vpop.f32.mrf.mxu1 }
  0xdb   :  { %v1137_v60 = vpop.f32.mrf.mxu3 }
  0xdc   :  { %v3855_v61 = vadd.f32 %v1041_v4, %v1019_v11  ;;  %v1106_v63 = vpop.f32.mrf.mxu2  ;;  %3152 = vmatmul.f32.vlgmr.msrb.gmra.mxu0 %v3091_v45 }
  0xdd   :  { %v1138_v0 = vadd.f32 %v1137_v60, %v1106_v63 }
  0xe1   :  { %v1163_v8 = vpop.f32.mrf.mxu0 }
  0xe2   :  { %v1164_v12 = vadd.f32 %v1163_v8, %v1138_v0  ;;  %v1338_v13 = vpop.f32.mrf.mxu1 }
  0xe3   :  { %v1238_v14 = vpop.f32.mrf.mxu3 }
  0xe4   :  { %v1189_v15 = vadd.f32 %v1188_v59, %v1164_v12  ;;  %v1215_v16 = vpop.f32.mrf.mxu2 }
  0xe6   :  { %v1216_v18 = vadd.f32 %v1215_v16, %v1189_v15 }
  0xe8   :  { %v3857_v20 = vadd.f32 %v1238_v14, %v1216_v18 }
  0xe9   :  { %v1307_v62 = vpop.f32.mrf.mxu0 }
  0xea   :  { %v1339_v1 = vadd.f32 %v1338_v13, %v1307_v62  ;;  %1242 = vrot.lane.b32.xlu1 %v3857_v20, %s3348_s0  ;;  %v1439_v2 = vpop.f32.mrf.mxu1 }
  0xeb   :  { %v1389_v26 = vpop.f32.mrf.mxu3 }
  0xec   :  { %v1364_v5 = vpop.f32.mrf.mxu2 }
  0xed   :  { %v1365_v27 = vadd.f32 %v1364_v5, %v1339_v1 }
  0xef   :  { %v1390_v6 = vadd.f32 %v1389_v26, %v1365_v27 }
  0xf1   :  { %v1416_v30 = vpop.f32.mrf.mxu0 }
  0xf2   :  { %v1417_v33 = vadd.f32 %v1416_v30, %v1390_v6  ;;  %v1586_v31 = vpop.f32.mrf.mxu1 }
  0xf3   :  { %v1535_v17 = vpop.f32.mrf.mxu3 }
  0xf4   :  { %v3861_v38 = vadd.f32 %v1439_v2, %v1417_v33  ;;  %v1504_v19 = vpop.f32.mrf.mxu2 }
  0xf5   :  { %v1536_v7 = vadd.f32 %v1535_v17, %v1504_v19 }
  0xf9   :  { %v1561_v39 = vpop.f32.mrf.mxu0 }
  0xfa   :  { %v1562_v21 = vadd.f32 %v1561_v39, %v1536_v7  ;;  %v1736_v41 = vpop.f32.mrf.mxu1 }
  0xfb   :  { %v1636_v24 = vpop.f32.mrf.mxu3 }
  0xfc   :  { %v1587_v44 = vadd.f32 %v1586_v31, %v1562_v21  ;;  %v1613_v9 = vpop.f32.mrf.mxu2 }
  0xfe   :  { %v1614_v45 = vadd.f32 %v1613_v9, %v1587_v44 }
 0x100   :  { %v3863_v40 = vadd.f32 %v1636_v24, %v1614_v45 }
 0x101   :  { %v1705_v32 = vpop.f32.mrf.mxu0 }
 0x102   :  { %v1737_v34 = vadd.f32 %v1736_v41, %v1705_v32  ;;  %1640 = vrot.lane.b32.xlu1 %v3863_v40, %s3348_s0  ;;  %v1837_v46 = vpop.f32.mrf.mxu1 }
 0x103   :  { %v1787_v47 = vpop.f32.mrf.mxu3 }
 0x104   :  { %v1762_v42 = vpop.f32.mrf.mxu2 }
 0x105   :  { %v1763_v35 = vadd.f32 %v1762_v42, %v1737_v34 }
 0x107   :  { %v1788_v43 = vadd.f32 %v1787_v47, %v1763_v35 }
 0x108   :  { %v247_v48 = vpop.permute.xlu2 %246 }
 0x109   :  { %v250_v29 = vsel %vm249_vm8, %v3781_v51, %v247_v48  ;;  %v1814_v49 = vpop.f32.mrf.mxu0 }
 0x10a   :  { %252 = vst.msk [vmem:[#allocation7] sm:$0xff] %vm251_vm9, %v250_v29  ;;  %v1815_v50 = vadd.f32 %v1814_v49, %v1788_v43  ;;  %v1984_v25 = vpop.f32.mrf.mxu1 }
 0x10b   :  { %v1933_v52 = vpop.f32.mrf.mxu3 }
 0x10c   :  { %v3870_v53 = vadd.f32 %v1837_v46, %v1815_v50  ;;  %v1902_v54 = vpop.f32.mrf.mxu2 }
 0x10d   :  { %v1934_v55 = vadd.f32 %v1933_v52, %v1902_v54 }
 0x111   :  { %v1959_v22 = vpop.f32.mrf.mxu0 }
 0x112   :  { %v1960_v56 = vadd.f32 %v1959_v22, %v1934_v55  ;;  %v2134_v4 = vpop.f32.mrf.mxu1 }
 0x113   :  { %v2034_v57 = vpop.f32.mrf.mxu3 }
 0x114   :  { %v1985_v37 = vadd.f32 %v1984_v25, %v1960_v56  ;;  %v2011_v10 = vpop.f32.mrf.mxu2 }
 0x116   :  { %v2012_v23 = vadd.f32 %v2011_v10, %v1985_v37 }
 0x118   :  { %v3872_v58 = vadd.f32 %v2034_v57, %v2012_v23 }
 0x119   :  { %v2103_v51 = vpop.f32.mrf.mxu0 }
 0x11a   :  { %2038 = vrot.lane.b32.xlu2 %v3872_v58, %s3348_s0  ;;  %v2235_v11 = vpop.f32.mrf.mxu1  ;;  %v2135_v27 = vadd.f32 %v2134_v4, %v2103_v51 }
 0x11b   :  { %v2185_v59 = vpop.f32.mrf.mxu3 }
 0x11c   :  { %v2160_v60 = vpop.f32.mrf.mxu2 }
 0x11d   :  { %v2161_v31 = vadd.f32 %v2160_v60, %v2135_v27 }
 0x11f   :  { %v2186_v19 = vadd.f32 %v2185_v59, %v2161_v31 }
 0x121   :  { %v2212_v63 = vpop.f32.mrf.mxu0 }
 0x122   :  { %v2382_v0 = vpop.f32.mrf.mxu1  ;;  %v2213_v39 = vadd.f32 %v2212_v63, %v2186_v19 }
 0x123   :  { %v2331_v8 = vpop.f32.mrf.mxu3 }
 0x124   :  { %v2300_v12 = vpop.f32.mrf.mxu2  ;;  %v3882_v44 = vadd.f32 %v2235_v11, %v2213_v39 }
 0x125   :  { %v2332_v13 = vadd.f32 %v2331_v8, %v2300_v12 }
 0x129   :  { %v2357_v14 = vpop.f32.mrf.mxu0 }
 0x12a   :  { %v2358_v15 = vadd.f32 %v2357_v14, %v2332_v13  ;;  %v2532_v16 = vpop.f32.mrf.mxu1 }
 0x12b   :  { %v2432_v18 = vpop.f32.mrf.mxu3 }
 0x12c   :  { %v2383_v62 = vadd.f32 %v2382_v0, %v2358_v15  ;;  %v2409_v1 = vpop.f32.mrf.mxu2  ;;  %v446_v24 = vpop.permute.xlu0 %445 }
 0x12d   :  { %v448_v55 = vsel %vm249_vm8, %v3810_v28, %v446_v24 }
 0x12e   :  { %v2410_v2 = vadd.f32 %v2409_v1, %v2383_v62 }
 0x130   :  { %v3876_v26 = vadd.f32 %v2432_v18, %v2410_v2 }
 0x131   :  { %v2501_v5 = vpop.f32.mrf.mxu0 }
 0x132   :  { %2436 = vrot.lane.b32.xlu2 %v3876_v26, %s3348_s0  ;;  %v2633_v30 = vpop.f32.mrf.mxu1  ;;  %v2533_v22 = vadd.f32 %v2532_v16, %v2501_v5 }
 0x133   :  { %v2583_v6 = vpop.f32.mrf.mxu3 }
 0x134   :  { %v2558_v33 = vpop.f32.mrf.mxu2 }
 0x135   :  { %v2559_v57 = vadd.f32 %v2558_v33, %v2533_v22 }
 0x137   :  { %v2584_v23 = vadd.f32 %v2583_v6, %v2559_v57 }
 0x139   :  { %v2610_v17 = vpop.f32.mrf.mxu0 }
 0x13a   :  { %1045 = vrot.lane.b32.xlu2 %v3855_v61, %s3348_s0  ;;  %v2780_v41 = vpop.f32.mrf.mxu1  ;;  %v2611_v11 = vadd.f32 %v2610_v17, %v2584_v23 }
 0x13b   :  { %v2729_v7 = vpop.f32.mrf.mxu3 }
 0x13c   :  { %v2698_v21 = vpop.f32.mrf.mxu2  ;;  %v2634_v28 = vadd.f32 %v2633_v30, %v2611_v11 }
 0x13d   :  { %v2730_v9 = vadd.f32 %v2729_v7, %v2698_v21 }
 0x141   :  { %v2755_v45 = vpop.f32.mrf.mxu0 }
 0x142   :  { %v2756_v32 = vadd.f32 %v2755_v45, %v2730_v9  ;;  %2239 = vrot.lane.b32.xlu2 %v3882_v44, %s3348_s0  ;;  %v2930_v43 = vpop.f32.mrf.mxu1 }
 0x143   :  { %v2830_v34 = vpop.f32.mrf.mxu3 }
 0x144   :  { %v2781_v46 = vadd.f32 %v2780_v41, %v2756_v32  ;;  %v2807_v47 = vpop.f32.mrf.mxu2  ;;  %v845_v35 = vpop.permute.xlu0 %844 }
 0x145   :  { %v847_v49 = vsel %vm249_vm8, %v3850_v3, %v845_v35 }
 0x146   :  { %v2808_v42 = vadd.f32 %v2807_v47, %v2781_v46 }
 0x148   :  { %v2831_v48 = vadd.f32 %v2830_v34, %v2808_v42 }
 0x149   :  { %v2899_v29 = vpop.f32.mrf.mxu0 }
 0x14a   :  { %2834 = vrot.lane.b32.xlu0 %v2831_v48, %s3348_s0  ;;  %849 = vrot.lane.b32.xlu2 %v847_v49, %s3349_s1  ;;  %v3031_v52 = vpop.f32.mrf.mxu1  ;;  %v2931_v14 = vadd.f32 %v2930_v43, %v2899_v29 }
 0x14b   :  { %v2981_v50 = vpop.f32.mrf.mxu3 }
 0x14c   :  { %v2956_v25 = vpop.f32.mrf.mxu2 }
 0x14d   :  { %v2957_v15 = vadd.f32 %v2956_v25, %v2931_v14 }
 0x14f   :  { %v2982_v16 = vadd.f32 %v2981_v50, %v2957_v15 }
 0x151   :  { %v3008_v54 = vpop.f32.mrf.mxu0 }
 0x152   :  { %450 = vrot.lane.b32.xlu0 %v448_v55, %s3349_s1  ;;  %v3178_v10 = vpop.f32.mrf.mxu1  ;;  %v3009_v18 = vadd.f32 %v3008_v54, %v2982_v16 }
 0x153   :  { %v3127_v4 = vpop.f32.mrf.mxu3 }
 0x154   :  { %v3096_v56 = vpop.f32.mrf.mxu2  ;;  %v3032_v2 = vadd.f32 %v3031_v52, %v3009_v18 }
 0x155   :  { %v3128_v37 = vadd.f32 %v3127_v4, %v3096_v56 }
 0x159   :  { %v3153_v3 = vpop.f32.mrf.mxu0 }
 0x15a   :  { %v3154_v51 = vadd.f32 %v3153_v3, %v3128_v37  ;;  %1443 = vrot.lane.b32.xlu0 %v3861_v38, %s3348_s0 }
 0x15b   :  { %v3228_v63 = vpop.f32.mrf.mxu3 }
 0x15c   :  { %v3179_v59 = vadd.f32 %v3178_v10, %v3154_v51  ;;  %v3205_v60 = vpop.f32.mrf.mxu2  ;;  %v1243_v12 = vpop.permute.xlu1 %1242 }
 0x15d   :  { %v1245_v13 = vsel %vm249_vm8, %v3857_v20, %v1243_v12 }
 0x15e   :  { %v3206_v0 = vadd.f32 %v3205_v60, %v3179_v59 }
 0x160   :  { %v3229_v8 = vadd.f32 %v3228_v63, %v3206_v0 }
 0x162   :  { %3232 = vrot.lane.b32.xlu1 %v3229_v8, %s3348_s0  ;;  %2637 = vrot.lane.b32.xlu0 %v2634_v28, %s3348_s0 }
 0x16a   :  { %647 = vrot.lane.b32.xlu1 %v3834_v36, %s3348_s0  ;;  %1247 = vrot.lane.b32.xlu0 %v1245_v13, %s3349_s1 }
 0x172   :  { %1841 = vrot.lane.b32.xlu1 %v3870_v53, %s3348_s0 }
 0x174   :  { %v2039_v62 = vpop.permute.xlu2 %2038  ;;  %v1641_v20 = vpop.permute.xlu1 %1640 }
 0x175   :  { %v2041_v1 = vsel %vm249_vm8, %v3872_v58, %v2039_v62  ;;  %v1643_v5 = vsel %vm249_vm8, %v3863_v40, %v1641_v20 }
 0x176   :  { %2043 = vrot.lane.b32.xlu2 %v2041_v1, %s3349_s1 }
 0x17a   :  { %3035 = vrot.lane.b32.xlu1 %v3032_v2, %s3348_s0 }
 0x182   :  { %1645 = vrot.lane.b32.xlu1 %v1643_v5, %s3349_s1 }
 0x18c   :  { %v2437_v27 = vpop.permute.xlu2 %2436 }
 0x18d   :  { %v2439_v6 = vsel %vm249_vm8, %v3876_v26, %v2437_v27 }
 0x18e   :  { %2441 = vrot.lane.b32.xlu0 %v2439_v6, %s3349_s1 }
 0x194   :  { %v1046_v30 = vpop.permute.xlu2 %1045 }
 0x195   :  { %v1048_v58 = vsel %vm249_vm8, %v3855_v61, %v1046_v30 }
 0x196   :  { %1049 = vst.msk [vmem:[#allocation7 + $0x10] sm:$0xff] %vm251_vm9, %v1048_v58 }
 0x19c   :  { %v2240_v33 = vpop.permute.xlu2 %2239 }
 0x19d   :  { %v2242_v31 = vsel %vm249_vm8, %v3882_v44, %v2240_v33 }
 0x19e   :  { %2243 = vst.msk [vmem:[#allocation7 + $0x28] sm:$0xff] %vm251_vm9, %v2242_v31 }
 0x1bc   :  { %v2835_v40 = vpop.permute.xlu0 %2834 }
 0x1bd   :  { %v2837_v17 = vsel %vm249_vm8, %v2831_v48, %v2835_v40 }
 0x1be   :  { %2839 = vrot.lane.b32.xlu1 %v2837_v17, %s3349_s1 }
 0x1c4   :  { %v451_v26 = vpop.permute.xlu0 %450 }
 0x1c5   :  { %454 = vst.msk [vmem:[#allocation7] sm:$0xff] %vm453_vm10, %v451_v26 }
 0x1cc   :  { %v1444_v19 = vpop.permute.xlu0 %1443 }
 0x1cd   :  { %v1446_v61 = vsel %vm249_vm8, %v3861_v38, %v1444_v19  ;;  %v850_v38 = vpop.permute.xlu2 %849 }
 0x1ce   :  { %1447 = vst.msk [vmem:[#allocation7 + $0x18] sm:$0xff] %vm251_vm9, %v1446_v61 }
 0x1d4   :  { %v3233_v7 = vpop.permute.xlu1 %3232  ;;  %v2638_v39 = vpop.permute.xlu0 %2637 }
 0x1d5   :  { %v2640_v21 = vsel %vm249_vm8, %v2634_v28, %v2638_v39  ;;  %v3235_v41 = vsel %vm249_vm8, %v3229_v8, %v3233_v7  ;;  %v2044_v34 = vpop.permute.xlu2 %2043 }
 0x1d6   :  { %2641 = vst.msk [vmem:[#allocation7 + $0x30] sm:$0xff] %vm251_vm9, %v2640_v21  ;;  %3237 = vrot.lane.b32.xlu2 %v3235_v41, %s3349_s1 }
 0x1dc   :  { %v648_v24 = vpop.permute.xlu1 %647  ;;  %v1248_v44 = vpop.permute.xlu0 %1247 }
 0x1dd   :  { %v650_v9 = vsel %vm249_vm8, %v3834_v36, %v648_v24  ;;  %1250 = vst.msk [vmem:[#allocation7 + $0x10] sm:$0xff] %vm453_vm10, %v1248_v44 }
 0x1de   :  { %651 = vst.msk [vmem:[#allocation7 + $0x8] sm:$0xff] %vm251_vm9, %v650_v9 }
 0x1df   :  { %852 = vst.msk [vmem:[#allocation7 + $0x8] sm:$0xff] %vm453_vm10, %v850_v38 }
 0x1e4   :  { %v1842_v45 = vpop.permute.xlu1 %1841 }
 0x1e5   :  { %v1844_v32 = vsel %vm249_vm8, %v3870_v53, %v1842_v45 }
 0x1e6   :  { %1845 = vst.msk [vmem:[#allocation7 + $0x20] sm:$0xff] %vm251_vm9, %v1844_v32 }
 0x1e7   :  { %2046 = vst.msk [vmem:[#allocation7 + $0x20] sm:$0xff] %vm453_vm10, %v2044_v34 }
 0x1ec   :  { %v3036_v46 = vpop.permute.xlu1 %3035 }
 0x1ed   :  { %v3038_v47 = vsel %vm249_vm8, %v3032_v2, %v3036_v46 }
 0x1ee   :  { %3039 = vst.msk [vmem:[#allocation7 + $0x38] sm:$0xff] %vm251_vm9, %v3038_v47 }
 0x1f4   :  { %v1646_v36 = vpop.permute.xlu1 %1645 }
 0x1f5   :  { %1648 = vst.msk [vmem:[#allocation7 + $0x18] sm:$0xff] %vm453_vm10, %v1646_v36 }
 0x200   :  { %v2442_v42 = vpop.permute.xlu0 %2441 }
 0x201   :  { %2444 = vst.msk [vmem:[#allocation7 + $0x28] sm:$0xff] %vm453_vm10, %v2442_v42 }
 0x230   :  { %v2840_v53 = vpop.permute.xlu1 %2839  ;;  %v3238_v35 = vpop.permute.xlu2 %3237 }
 0x231   :  { %2842 = vst.msk [vmem:[#allocation7 + $0x30] sm:$0xff] %vm453_vm10, %v2840_v53 }
 0x232   :  { %3240 = vst.msk [vmem:[#allocation7 + $0x38] sm:$0xff] %vm453_vm10, %v3238_v35 }
 0x233   :  { %3251 = dma.vmem_to_hbm [thread:$0]  %s3247_s22, 1024, %s3249_s25, [#allocation4]  }
 0x234   :  { %3342 = dma.done.wait [#allocation4], 1024  }
 0x235   :  { %3343 = vsyncadd [#allocation4], 4294966272 }
 0x236   :  { %3256 = vsyncpa [#allocation3], 1 }
 0x237   :  { %3257 = vsyncpa [#allocation6], 1 }
 0x238   :  { %3258 = vsyncpa [#allocation4], 1 }

</bundles_post_ra>
